<compile_context>
chip_gen: v6e
topology: v6e:2x2x1
jax: 0.10.0
libtpu: 0.0.40
codegen_flags: <defaults>
</compile_context>

<pallas_src>
import numpy as np
import jax
import jax.numpy as jnp
from jax.experimental import pallas as pl
from jax.experimental.pallas import tpu as pltpu


# Tap order (dy, dx) must match the host-side weight column order (ky*3+kx, c).
_TAPS = [(dy, dx) for dy in (-1, 0, 1) for dx in (-1, 0, 1)]


# ---------------------------------------------------------------------------
# Host-side constants
# ---------------------------------------------------------------------------
def _bilinear_matrix(in_size):
    # PyTorch bilinear upsample (scale=2, align_corners=False) as a dense
    # (2*in_size, in_size) interpolation matrix with clamped borders.
    out_size = 2 * in_size
    m = np.zeros((out_size, in_size), np.float32)
    for o in range(out_size):
        s = (o + 0.5) / 2.0 - 0.5
        s0 = int(np.floor(s))
        frac = s - s0
        i0 = min(max(s0, 0), in_size - 1)
        i1 = min(max(s0 + 1, 0), in_size - 1)
        m[o, i0] += 1.0 - frac
        m[o, i1] += frac
    return m


def _upsample_kron_t(h, w):
    # (H*W, 4*H*W) matrix U such that y_flat @ U == bilinear-x2(y) flattened
    # row-major.  Entries are products of {0.25, 0.75, 1.0} -> exact in bf16,
    # so storing it bf16 (and upcasting in-kernel) is bit-identical to f32.
    k = np.kron(_bilinear_matrix(h), _bilinear_matrix(w))   # (4HW, HW)
    return jnp.asarray(k.T).astype(jnp.bfloat16)


def _tap_masks(h, w):
    # (9, 1, H*W) 0/1 validity masks: mask[t, 0, p] == 1 iff tap t=(dy,dx) of
    # output pixel p reads an in-bounds input pixel (zero-padding otherwise).
    # They also zero the wrap-around positions introduced by the lane rolls.
    hw = h * w
    r = np.arange(hw) // w
    c = np.arange(hw) % w
    m = np.zeros((9, 1, hw), np.float32)
    for t, (dy, dx) in enumerate(_TAPS):
        valid = (r + dy >= 0) & (r + dy < h) & (c + dx >= 0) & (c + dx < w)
        m[t, 0, :] = valid.astype(np.float32)
    return jnp.asarray(m)


# ---------------------------------------------------------------------------
# Fused kernel: conv3x3+BN+ReLU  ->  conv3x3+BN+ReLU  ->  bilinear x2
# ---------------------------------------------------------------------------
def _make_decoder_kernel(h, w):
    hw = h * w

    def kernel(x_ref, w1_ref, b1_ref, w2_ref, b2_ref, m_ref, up_ref, o_ref):
        masks = m_ref[...]                                # (9, 1, HW), read once

        def conv3x3_bias_relu(x_flat, w2d, bias):
            # x_flat: (C, HW) lane-dense.  Build the 9 taps with XLU lane rolls
            # + border masks (no padding matmul, no unaligned slices), stack
            # them along sublanes (C % 8 == 0 -> vreg-aligned concat) and do
            # ONE MXU matmul with K = 9*C.  BN scale is folded into w2d, so the
            # epilogue is just bias-add + ReLU.
            taps = []
            for t, (dy, dx) in enumerate(_TAPS):
                s = dy * w + dx                           # flat-index shift of tap t
                if s == 0:
                    taps.append(x_flat)                   # center tap: no roll, no mask
                else:
                    shifted = pltpu.roll(x_flat, shift=(-s) % hw, axis=1)
                    taps.append(shifted * masks[t])       # (1, HW) broadcast over rows
            xcol = jnp.concatenate(taps, axis=0)          # (9C, HW)
            y = jnp.dot(w2d, xcol, preferred_element_type=jnp.float32)  # (Cout, HW)
            return jnp.maximum(y + bias, 0.0)

        x = x_ref[0].astype(jnp.float32)                  # (Cin, HW)
        w1 = w1_ref[...]
        b1 = b1_ref[...]
        w2 = w2_ref[...]
        b2 = b2_ref[...]
        up = up_ref[...].astype(jnp.float32)              # bf16 -> f32 (exact)

        y1 = conv3x3_bias_relu(x, w1, b1)                 # (mid, HW)   stays in VMEM
        y2 = conv3x3_bias_relu(y1, w2, b2)                # (Cout, HW)  stays in VMEM
        # bilinear x2 upsample == one lane-dense matmul with kron(Uh, Uw)^T
        out = jnp.dot(y2, up, preferred_element_type=jnp.float32)       # (Cout, 4HW)
        o_ref[0] = out.astype(o_ref.dtype)

    return kernel


def _fold_conv_bn(w, b, gamma, beta, mean, var, eps=1e-5):
    # Fold inference-mode BN into the conv.  Returns (O, 9*C) weight whose
    # column order (tap-major, channel-minor: col = t*C + c) matches the
    # tap-major im2col stack built in the kernel, and an (O, 1) bias.
    scale = gamma / jnp.sqrt(var + eps)                              # (O,)
    w_f = w * scale[:, None, None, None]                             # (O, C, 3, 3)
    b_f = beta + (b - mean) * scale                                  # (O,)
    w2d = jnp.transpose(w_f, (0, 2, 3, 1)).reshape(w.shape[0], -1)   # (O, 9*C)
    return w2d.astype(jnp.float32), b_f.reshape(-1, 1).astype(jnp.float32)


def decoder_block_forward(x, p):
    n, cin, h, w = x.shape
    mid = p['w1'].shape[0]
    cout = p['w2'].shape[0]
    hw = h * w

    w1_2d, b1 = _fold_conv_bn(p['w1'], p['b1'], p['gamma1'], p['beta1'],
                              p['mean1'], p['var1'])
    w2_2d, b2 = _fold_conv_bn(p['w2'], p['b2'], p['gamma2'], p['beta2'],
                              p['mean2'], p['var2'])
    masks = _tap_masks(h, w)                 # (9, 1, HW) f32, ~9 KB
    up_mat = _upsample_kron_t(h, w)          # (HW, 4*HW) bf16 (exact), 0.5 MB @16x16

    x_flat = x.reshape(n, cin, hw)           # lane-dense input layout (free reshape)

    out_flat = pl.pallas_call(
        _make_decoder_kernel(h, w),
        out_shape=jax.ShapeDtypeStruct((n, cout, 4 * hw), x.dtype),
        grid_spec=pltpu.PrefetchScalarGridSpec(
            num_scalar_prefetch=0,
            grid=(n,),
            in_specs=[
                pl.BlockSpec((1, cin, hw), lambda bi: (bi, 0, 0)),
                # grid-invariant operands (constant index_maps -> fetched once):
                pl.BlockSpec((mid, 9 * cin), lambda bi: (0, 0)),
                pl.BlockSpec((mid, 1), lambda bi: (0, 0)),
                pl.BlockSpec((cout, 9 * mid), lambda bi: (0, 0)),
                pl.BlockSpec((cout, 1), lambda bi: (0, 0)),
                pl.BlockSpec((9, 1, hw), lambda bi: (0, 0, 0)),
                pl.BlockSpec((hw, 4 * hw), lambda bi: (0, 0)),
            ],
            out_specs=pl.BlockSpec((1, cout, 4 * hw), lambda bi: (bi, 0, 0)),
        ),
        compiler_params=pltpu.CompilerParams(
            dimension_semantics=("parallel",)),
    )(x_flat, w1_2d, b1, w2_2d, b2, masks, up_mat)

    # Lane-dense kernel output -> NCHW (contiguous, free reshape in the wrapper).
    return out_flat.reshape(n, cout, 2 * h, 2 * w)


# ---------------------------------------------------------------------------
# Parameters
# ---------------------------------------------------------------------------
def init_decoder_params(key, in_channels, out_channels):
    mid = in_channels // 4
    ks = jax.random.split(key, 12)
    return {
        'w1': 0.1 * jax.random.normal(ks[0], (mid, in_channels, 3, 3), jnp.float32),
        'b1': 0.1 * jax.random.normal(ks[1], (mid,), jnp.float32),
        'gamma1': 1.0 + 0.1 * jax.random.normal(ks[2], (mid,), jnp.float32),
        'beta1': 0.1 * jax.random.normal(ks[3], (mid,), jnp.float32),
        'mean1': 0.1 * jax.random.normal(ks[4], (mid,), jnp.float32),
        'var1': 1.0 + 0.1 * jnp.abs(jax.random.normal(ks[5], (mid,), jnp.float32)),
        'w2': 0.1 * jax.random.normal(ks[6], (out_channels, mid, 3, 3), jnp.float32),
        'b2': 0.1 * jax.random.normal(ks[7], (out_channels,), jnp.float32),
        'gamma2': 1.0 + 0.1 * jax.random.normal(ks[8], (out_channels,), jnp.float32),
        'beta2': 0.1 * jax.random.normal(ks[9], (out_channels,), jnp.float32),
        'mean2': 0.1 * jax.random.normal(ks[10], (out_channels,), jnp.float32),
        'var2': 1.0 + 0.1 * jnp.abs(jax.random.normal(ks[11], (out_channels,), jnp.float32)),
    }


# ---------------------------------------------------------------------------
# Pure-JAX reference (correctness check only)
# ---------------------------------------------------------------------------
def reference_forward(x, p):
    def conv_bn_relu_ref(xi, w, b, gamma, beta, mean, var):
        y = jax.lax.conv_general_dilated(
            xi, w, (1, 1), ((1, 1), (1, 1)),
            dimension_numbers=('NCHW', 'OIHW', 'NCHW'))
        y = y + b[None, :, None, None]
        y = (y - mean[None, :, None, None]) / jnp.sqrt(var[None, :, None, None] + 1e-5)
        y = y * gamma[None, :, None, None] + beta[None, :, None, None]
        return jnp.maximum(y, 0.0)

    y = conv_bn_relu_ref(x, p['w1'], p['b1'], p['gamma1'], p['beta1'],
                         p['mean1'], p['var1'])
    y = conv_bn_relu_ref(y, p['w2'], p['b2'], p['gamma2'], p['beta2'],
                         p['mean2'], p['var2'])
    uh = jnp.asarray(_bilinear_matrix(y.shape[2]))
    uw = jnp.asarray(_bilinear_matrix(y.shape[3]))
    return jnp.einsum('oh,nchw,pw->ncop', uh, y, uw)


if __name__ == "__main__":
    key = jax.random.PRNGKey(0)
    kx, kp = jax.random.split(key)

    # DecoderBlock(in_channels=32, out_channels=16): mid = 8, H = W = 16.
    N, Cin, H, W = 2, 32, 16, 16
    Cout = 16

    x = jax.random.normal(kx, (N, Cin, H, W), jnp.float32)
    params = init_decoder_params(kp, Cin, Cout)

    out = jax.block_until_ready(decoder_block_forward(x, params))
    assert out.shape == (N, Cout, 2 * H, 2 * W), out.shape

    ref = reference_forward(x, params)
    np.testing.assert_allclose(np.asarray(out), np.asarray(ref),
                               atol=5e-4, rtol=5e-4)
    print("KERNEL_OK")
</pallas_src>

<mosaic_0001>
module attributes {stable_mosaic.version = 11 : i64} {
  func.func @kernel(%arg0: i32, %arg1: memref<1x32x256xf32, #tpu.memory_space<vmem>>, %arg2: memref<8x288xf32, #tpu.memory_space<vmem>>, %arg3: memref<8x1xf32, #tpu.memory_space<vmem>>, %arg4: memref<16x72xf32, #tpu.memory_space<vmem>>, %arg5: memref<16x1xf32, #tpu.memory_space<vmem>>, %arg6: memref<9x1x256xf32, #tpu.memory_space<vmem>>, %arg7: memref<256x1024xbf16, #tpu.memory_space<vmem>>, %arg8: memref<1x16x1024xf32, #tpu.memory_space<vmem>>) attributes {dimension_semantics = [#tpu.dimension_semantics<parallel>], iteration_bounds = array<i64: 2>, scalar_prefetch = 0 : i64, scratch_operands = 0 : i64, tpu.core_type = #tpu.core_type<tc>, window_params = [{transform_indices = @transform_0, window_bounds = array<i64: 1, 32, 256>}, {pipeline_mode = #tpu.pipeline_mode<synchronous>, transform_indices = @transform_1, window_bounds = array<i64: 8, 288>}, {pipeline_mode = #tpu.pipeline_mode<synchronous>, transform_indices = @transform_2, window_bounds = array<i64: 8, 1>}, {pipeline_mode = #tpu.pipeline_mode<synchronous>, transform_indices = @transform_3, window_bounds = array<i64: 16, 72>}, {pipeline_mode = #tpu.pipeline_mode<synchronous>, transform_indices = @transform_4, window_bounds = array<i64: 16, 1>}, {pipeline_mode = #tpu.pipeline_mode<synchronous>, transform_indices = @transform_5, window_bounds = array<i64: 9, 1, 256>}, {pipeline_mode = #tpu.pipeline_mode<synchronous>, transform_indices = @transform_6, window_bounds = array<i64: 256, 1024>}, {transform_indices = @transform_7, window_bounds = array<i64: 1, 16, 1024>}]} {
    %c0 = arith.constant 0 : index
    %c0_0 = arith.constant 0 : index
    %c0_1 = arith.constant 0 : index
    %0 = vector.load %arg6[%c0, %c0_0, %c0_1] : memref<9x1x256xf32, #tpu.memory_space<vmem>>, vector<9x1x256xf32>
    %c0_2 = arith.constant 0 : index
    %c0_3 = arith.constant 0 : index
    %c0_4 = arith.constant 0 : index
    %1 = vector.load %arg1[%c0_2, %c0_3, %c0_4] : memref<1x32x256xf32, #tpu.memory_space<vmem>>, vector<1x32x256xf32>
    %2 = vector.shape_cast %1 : vector<1x32x256xf32> to vector<32x256xf32>
    %c0_5 = arith.constant 0 : index
    %c0_6 = arith.constant 0 : index
    %3 = vector.load %arg2[%c0_5, %c0_6] : memref<8x288xf32, #tpu.memory_space<vmem>>, vector<8x288xf32>
    %c0_7 = arith.constant 0 : index
    %c0_8 = arith.constant 0 : index
    %4 = vector.load %arg3[%c0_7, %c0_8] : memref<8x1xf32, #tpu.memory_space<vmem>>, vector<8x1xf32>
    %c0_9 = arith.constant 0 : index
    %c0_10 = arith.constant 0 : index
    %5 = vector.load %arg4[%c0_9, %c0_10] : memref<16x72xf32, #tpu.memory_space<vmem>>, vector<16x72xf32>
    %c0_11 = arith.constant 0 : index
    %c0_12 = arith.constant 0 : index
    %6 = vector.load %arg5[%c0_11, %c0_12] : memref<16x1xf32, #tpu.memory_space<vmem>>, vector<16x1xf32>
    %c0_13 = arith.constant 0 : index
    %c0_14 = arith.constant 0 : index
    %7 = vector.load %arg7[%c0_13, %c0_14] : memref<256x1024xbf16, #tpu.memory_space<vmem>>, vector<256x1024xbf16>
    %8 = arith.extf %7 : vector<256x1024xbf16> to vector<256x1024xf32>
    %c17_i32 = arith.constant 17 : i32
    %9 = tpu.dynamic_rotate %2 by %c17_i32 dim 1 : vector<32x256xf32>, i32 -> vector<32x256xf32>
    %10 = vector.extract_strided_slice %0 {offsets = [0, 0, 0], sizes = [1, 1, 256], strides = [1, 1, 1]} : vector<9x1x256xf32> to vector<1x1x256xf32>
    %11 = vector.shape_cast %10 : vector<1x1x256xf32> to vector<1x256xf32>
    %12 = vector.broadcast %11 : vector<1x256xf32> to vector<32x256xf32>
    %13 = arith.mulf %9, %12 : vector<32x256xf32>
    %c16_i32 = arith.constant 16 : i32
    %14 = tpu.dynamic_rotate %2 by %c16_i32 dim 1 : vector<32x256xf32>, i32 -> vector<32x256xf32>
    %15 = vector.extract_strided_slice %0 {offsets = [1, 0, 0], sizes = [1, 1, 256], strides = [1, 1, 1]} : vector<9x1x256xf32> to vector<1x1x256xf32>
    %16 = vector.shape_cast %15 : vector<1x1x256xf32> to vector<1x256xf32>
    %17 = vector.broadcast %16 : vector<1x256xf32> to vector<32x256xf32>
    %18 = arith.mulf %14, %17 : vector<32x256xf32>
    %c15_i32 = arith.constant 15 : i32
    %19 = tpu.dynamic_rotate %2 by %c15_i32 dim 1 : vector<32x256xf32>, i32 -> vector<32x256xf32>
    %20 = vector.extract_strided_slice %0 {offsets = [2, 0, 0], sizes = [1, 1, 256], strides = [1, 1, 1]} : vector<9x1x256xf32> to vector<1x1x256xf32>
    %21 = vector.shape_cast %20 : vector<1x1x256xf32> to vector<1x256xf32>
    %22 = vector.broadcast %21 : vector<1x256xf32> to vector<32x256xf32>
    %23 = arith.mulf %19, %22 : vector<32x256xf32>
    %c1_i32 = arith.constant 1 : i32
    %24 = tpu.dynamic_rotate %2 by %c1_i32 dim 1 : vector<32x256xf32>, i32 -> vector<32x256xf32>
    %25 = vector.extract_strided_slice %0 {offsets = [3, 0, 0], sizes = [1, 1, 256], strides = [1, 1, 1]} : vector<9x1x256xf32> to vector<1x1x256xf32>
    %26 = vector.shape_cast %25 : vector<1x1x256xf32> to vector<1x256xf32>
    %27 = vector.broadcast %26 : vector<1x256xf32> to vector<32x256xf32>
    %28 = arith.mulf %24, %27 : vector<32x256xf32>
    %c255_i32 = arith.constant 255 : i32
    %29 = tpu.dynamic_rotate %2 by %c255_i32 dim 1 : vector<32x256xf32>, i32 -> vector<32x256xf32>
    %30 = vector.extract_strided_slice %0 {offsets = [5, 0, 0], sizes = [1, 1, 256], strides = [1, 1, 1]} : vector<9x1x256xf32> to vector<1x1x256xf32>
    %31 = vector.shape_cast %30 : vector<1x1x256xf32> to vector<1x256xf32>
    %32 = vector.broadcast %31 : vector<1x256xf32> to vector<32x256xf32>
    %33 = arith.mulf %29, %32 : vector<32x256xf32>
    %c241_i32 = arith.constant 241 : i32
    %34 = tpu.dynamic_rotate %2 by %c241_i32 dim 1 : vector<32x256xf32>, i32 -> vector<32x256xf32>
    %35 = vector.extract_strided_slice %0 {offsets = [6, 0, 0], sizes = [1, 1, 256], strides = [1, 1, 1]} : vector<9x1x256xf32> to vector<1x1x256xf32>
    %36 = vector.shape_cast %35 : vector<1x1x256xf32> to vector<1x256xf32>
    %37 = vector.broadcast %36 : vector<1x256xf32> to vector<32x256xf32>
    %38 = arith.mulf %34, %37 : vector<32x256xf32>
    %c240_i32 = arith.constant 240 : i32
    %39 = tpu.dynamic_rotate %2 by %c240_i32 dim 1 : vector<32x256xf32>, i32 -> vector<32x256xf32>
    %40 = vector.extract_strided_slice %0 {offsets = [7, 0, 0], sizes = [1, 1, 256], strides = [1, 1, 1]} : vector<9x1x256xf32> to vector<1x1x256xf32>
    %41 = vector.shape_cast %40 : vector<1x1x256xf32> to vector<1x256xf32>
    %42 = vector.broadcast %41 : vector<1x256xf32> to vector<32x256xf32>
    %43 = arith.mulf %39, %42 : vector<32x256xf32>
    %c239_i32 = arith.constant 239 : i32
    %44 = tpu.dynamic_rotate %2 by %c239_i32 dim 1 : vector<32x256xf32>, i32 -> vector<32x256xf32>
    %45 = vector.extract_strided_slice %0 {offsets = [8, 0, 0], sizes = [1, 1, 256], strides = [1, 1, 1]} : vector<9x1x256xf32> to vector<1x1x256xf32>
    %46 = vector.shape_cast %45 : vector<1x1x256xf32> to vector<1x256xf32>
    %47 = vector.broadcast %46 : vector<1x256xf32> to vector<32x256xf32>
    %48 = arith.mulf %44, %47 : vector<32x256xf32>
    %49 = tpu.concatenate %13, %18, %23, %28, %2, %33, %38, %43, %48 in 0 : vector<32x256xf32>, vector<32x256xf32>, vector<32x256xf32>, vector<32x256xf32>, vector<32x256xf32>, vector<32x256xf32>, vector<32x256xf32>, vector<32x256xf32>, vector<32x256xf32> -> vector<288x256xf32>
    %cst = arith.constant dense<0.000000e+00> : vector<8x256xf32>
    %50 = tpu.matmul %3, %49, %cst {dimension_numbers = #tpu.dot_dimension_numbers<[1], [0], [0], [1], [0, 0, 1, 1], [], []>} : vector<8x288xf32>, vector<288x256xf32>, vector<8x256xf32> -> vector<8x256xf32>
    %51 = vector.broadcast %4 : vector<8x1xf32> to vector<8x256xf32>
    %52 = arith.addf %50, %51 : vector<8x256xf32>
    %cst_15 = arith.constant 0.000000e+00 : f32
    %53 = vector.broadcast %cst_15 : f32 to vector<8x256xf32>
    %54 = arith.maximumf %52, %53 : vector<8x256xf32>
    %c17_i32_16 = arith.constant 17 : i32
    %55 = tpu.dynamic_rotate %54 by %c17_i32_16 dim 1 : vector<8x256xf32>, i32 -> vector<8x256xf32>
    %56 = vector.extract_strided_slice %0 {offsets = [0, 0, 0], sizes = [1, 1, 256], strides = [1, 1, 1]} : vector<9x1x256xf32> to vector<1x1x256xf32>
    %57 = vector.shape_cast %56 : vector<1x1x256xf32> to vector<1x256xf32>
    %58 = vector.broadcast %57 : vector<1x256xf32> to vector<8x256xf32>
    %59 = arith.mulf %55, %58 : vector<8x256xf32>
    %c16_i32_17 = arith.constant 16 : i32
    %60 = tpu.dynamic_rotate %54 by %c16_i32_17 dim 1 : vector<8x256xf32>, i32 -> vector<8x256xf32>
    %61 = vector.extract_strided_slice %0 {offsets = [1, 0, 0], sizes = [1, 1, 256], strides = [1, 1, 1]} : vector<9x1x256xf32> to vector<1x1x256xf32>
    %62 = vector.shape_cast %61 : vector<1x1x256xf32> to vector<1x256xf32>
    %63 = vector.broadcast %62 : vector<1x256xf32> to vector<8x256xf32>
    %64 = arith.mulf %60, %63 : vector<8x256xf32>
    %c15_i32_18 = arith.constant 15 : i32
    %65 = tpu.dynamic_rotate %54 by %c15_i32_18 dim 1 : vector<8x256xf32>, i32 -> vector<8x256xf32>
    %66 = vector.extract_strided_slice %0 {offsets = [2, 0, 0], sizes = [1, 1, 256], strides = [1, 1, 1]} : vector<9x1x256xf32> to vector<1x1x256xf32>
    %67 = vector.shape_cast %66 : vector<1x1x256xf32> to vector<1x256xf32>
    %68 = vector.broadcast %67 : vector<1x256xf32> to vector<8x256xf32>
    %69 = arith.mulf %65, %68 : vector<8x256xf32>
    %c1_i32_19 = arith.constant 1 : i32
    %70 = tpu.dynamic_rotate %54 by %c1_i32_19 dim 1 : vector<8x256xf32>, i32 -> vector<8x256xf32>
    %71 = vector.extract_strided_slice %0 {offsets = [3, 0, 0], sizes = [1, 1, 256], strides = [1, 1, 1]} : vector<9x1x256xf32> to vector<1x1x256xf32>
    %72 = vector.shape_cast %71 : vector<1x1x256xf32> to vector<1x256xf32>
    %73 = vector.broadcast %72 : vector<1x256xf32> to vector<8x256xf32>
    %74 = arith.mulf %70, %73 : vector<8x256xf32>
    %c255_i32_20 = arith.constant 255 : i32
    %75 = tpu.dynamic_rotate %54 by %c255_i32_20 dim 1 : vector<8x256xf32>, i32 -> vector<8x256xf32>
    %76 = vector.extract_strided_slice %0 {offsets = [5, 0, 0], sizes = [1, 1, 256], strides = [1, 1, 1]} : vector<9x1x256xf32> to vector<1x1x256xf32>
    %77 = vector.shape_cast %76 : vector<1x1x256xf32> to vector<1x256xf32>
    %78 = vector.broadcast %77 : vector<1x256xf32> to vector<8x256xf32>
    %79 = arith.mulf %75, %78 : vector<8x256xf32>
    %c241_i32_21 = arith.constant 241 : i32
    %80 = tpu.dynamic_rotate %54 by %c241_i32_21 dim 1 : vector<8x256xf32>, i32 -> vector<8x256xf32>
    %81 = vector.extract_strided_slice %0 {offsets = [6, 0, 0], sizes = [1, 1, 256], strides = [1, 1, 1]} : vector<9x1x256xf32> to vector<1x1x256xf32>
    %82 = vector.shape_cast %81 : vector<1x1x256xf32> to vector<1x256xf32>
    %83 = vector.broadcast %82 : vector<1x256xf32> to vector<8x256xf32>
    %84 = arith.mulf %80, %83 : vector<8x256xf32>
    %c240_i32_22 = arith.constant 240 : i32
    %85 = tpu.dynamic_rotate %54 by %c240_i32_22 dim 1 : vector<8x256xf32>, i32 -> vector<8x256xf32>
    %86 = vector.extract_strided_slice %0 {offsets = [7, 0, 0], sizes = [1, 1, 256], strides = [1, 1, 1]} : vector<9x1x256xf32> to vector<1x1x256xf32>
    %87 = vector.shape_cast %86 : vector<1x1x256xf32> to vector<1x256xf32>
    %88 = vector.broadcast %87 : vector<1x256xf32> to vector<8x256xf32>
    %89 = arith.mulf %85, %88 : vector<8x256xf32>
    %c239_i32_23 = arith.constant 239 : i32
    %90 = tpu.dynamic_rotate %54 by %c239_i32_23 dim 1 : vector<8x256xf32>, i32 -> vector<8x256xf32>
    %91 = vector.extract_strided_slice %0 {offsets = [8, 0, 0], sizes = [1, 1, 256], strides = [1, 1, 1]} : vector<9x1x256xf32> to vector<1x1x256xf32>
    %92 = vector.shape_cast %91 : vector<1x1x256xf32> to vector<1x256xf32>
    %93 = vector.broadcast %92 : vector<1x256xf32> to vector<8x256xf32>
    %94 = arith.mulf %90, %93 : vector<8x256xf32>
    %95 = tpu.concatenate %59, %64, %69, %74, %54, %79, %84, %89, %94 in 0 : vector<8x256xf32>, vector<8x256xf32>, vector<8x256xf32>, vector<8x256xf32>, vector<8x256xf32>, vector<8x256xf32>, vector<8x256xf32>, vector<8x256xf32>, vector<8x256xf32> -> vector<72x256xf32>
    %cst_24 = arith.constant dense<0.000000e+00> : vector<16x256xf32>
    %96 = tpu.matmul %5, %95, %cst_24 {dimension_numbers = #tpu.dot_dimension_numbers<[1], [0], [0], [1], [0, 0, 1, 1], [], []>} : vector<16x72xf32>, vector<72x256xf32>, vector<16x256xf32> -> vector<16x256xf32>
    %97 = vector.broadcast %6 : vector<16x1xf32> to vector<16x256xf32>
    %98 = arith.addf %96, %97 : vector<16x256xf32>
    %cst_25 = arith.constant 0.000000e+00 : f32
    %99 = vector.broadcast %cst_25 : f32 to vector<16x256xf32>
    %100 = arith.maximumf %98, %99 : vector<16x256xf32>
    %cst_26 = arith.constant dense<0.000000e+00> : vector<16x1024xf32>
    %101 = tpu.matmul %100, %8, %cst_26 {dimension_numbers = #tpu.dot_dimension_numbers<[1], [0], [0], [1], [0, 0, 1, 1], [], []>} : vector<16x256xf32>, vector<256x1024xf32>, vector<16x1024xf32> -> vector<16x1024xf32>
    %c0_27 = arith.constant 0 : index
    %c0_28 = arith.constant 0 : index
    %c0_29 = arith.constant 0 : index
    %102 = vector.load %arg8[%c0_27, %c0_28, %c0_29] : memref<1x16x1024xf32, #tpu.memory_space<vmem>>, vector<1x16x1024xf32>
    %103 = vector.shape_cast %102 : vector<1x16x1024xf32> to vector<16x1024xf32>
    %104 = vector.shape_cast %101 : vector<16x1024xf32> to vector<1x16x1024xf32>
    tpu.vector_store %arg8[%c0_27, %c0_28, %c0_29], %104 {strides = array<i32>} : memref<1x16x1024xf32, #tpu.memory_space<vmem>>, vector<1x16x1024xf32>,
    return
  }
  func.func @transform_0(%arg0: i32) -> (i32, i32, i32) {
    %c0_i32 = arith.constant 0 : i32
    %c0_i32_0 = arith.constant 0 : i32
    %c0_i32_1 = arith.constant 0 : i32
    return %arg0, %c0_i32, %c0_i32_0 : i32, i32, i32
  }
  func.func @transform_1(%arg0: i32) -> (i32, i32) {
    %c0_i32 = arith.constant 0 : i32
    %c0_i32_0 = arith.constant 0 : i32
    %c0_i32_1 = arith.constant 0 : i32
    return %c0_i32, %c0_i32_0 : i32, i32
  }
  func.func @transform_2(%arg0: i32) -> (i32, i32) {
    %c0_i32 = arith.constant 0 : i32
    %c0_i32_0 = arith.constant 0 : i32
    %c0_i32_1 = arith.constant 0 : i32
    return %c0_i32, %c0_i32_0 : i32, i32
  }
  func.func @transform_3(%arg0: i32) -> (i32, i32) {
    %c0_i32 = arith.constant 0 : i32
    %c0_i32_0 = arith.constant 0 : i32
    %c0_i32_1 = arith.constant 0 : i32
    return %c0_i32, %c0_i32_0 : i32, i32
  }
  func.func @transform_4(%arg0: i32) -> (i32, i32) {
    %c0_i32 = arith.constant 0 : i32
    %c0_i32_0 = arith.constant 0 : i32
    %c0_i32_1 = arith.constant 0 : i32
    return %c0_i32, %c0_i32_0 : i32, i32
  }
  func.func @transform_5(%arg0: i32) -> (i32, i32, i32) {
    %c0_i32 = arith.constant 0 : i32
    %c0_i32_0 = arith.constant 0 : i32
    %c0_i32_1 = arith.constant 0 : i32
    %c0_i32_2 = arith.constant 0 : i32
    return %c0_i32, %c0_i32_0, %c0_i32_1 : i32, i32, i32
  }
  func.func @transform_6(%arg0: i32) -> (i32, i32) {
    %c0_i32 = arith.constant 0 : i32
    %c0_i32_0 = arith.constant 0 : i32
    %c0_i32_1 = arith.constant 0 : i32
    return %c0_i32, %c0_i32_0 : i32, i32
  }
  func.func @transform_7(%arg0: i32) -> (i32, i32, i32) {
    %c0_i32 = arith.constant 0 : i32
    %c0_i32_0 = arith.constant 0 : i32
    %c0_i32_1 = arith.constant 0 : i32
    return %arg0, %c0_i32, %c0_i32_0 : i32, i32, i32
  }
}

</mosaic_0001>

<bundles_post_ra>
// kernel: tpu_custom_call.1
= control target key start
LH: loop header
LB: loop body
LE: loop exit
PB: predicated region body
PF: predicated region fallthrough
CT: control target
= control target key end

     0   :  { %s2978_s0 = inlined_call_operand.hbm [shape: f32[2,32,256], index: 0, kind: input, shape index: {}]   ;;  %s2979_s1 = inlined_call_operand.vmem [shape: f32[8,288], index: 1, kind: input, shape index: {}]   ;;  %s2980_s2 = inlined_call_operand.vmem [shape: f32[8,1], index: 2, kind: input, shape index: {}]   ;;  %s2981_s3 = inlined_call_operand.hbm [shape: f32[16,72], index: 3, kind: input, shape index: {}]   ;;  %s2982_s4 = inlined_call_operand.vmem [shape: f32[16,1], index: 4, kind: input, shape index: {}]   ;;  %s2983_s5 = inlined_call_operand.hbm [shape: f32[9,1,256], index: 5, kind: input, shape index: {}]   ;;  %s2984_s6 = inlined_call_operand.hbm [shape: bf16[256,1024], index: 6, kind: input, shape index: {}]   ;;  %s2985_s7 = inlined_call_operand.hbm [shape: f32[2,16,1024], index: 7, kind: output, shape index: {}]  }
   0x1   :  { %2990 = sst [smem:[#allocation15_spill]] %s2981_s3 }
   0x2   :  { %12 = vsyncpa [#allocation3], 0 }
   0x3   :  { %14 = vsyncpa [#allocation3 + $0x1], 0 }
   0x4   :  { %15 = vsyncpa [#allocation6], 0 }
   0x5   :  { %16 = vsyncpa [#allocation9], 0 }
   0x6   :  { %17 = vsyncpa [#allocation4], 0 }
   0x7   :  { %19 = vsyncpa [#allocation4 + $0x1], 0  ;;  %s2225_s24 = smov 0   ;;  %s2227_s25 = smov 0  }
   0x8   :  { %s2229_s26 = smov 0   ;;  %s2231_s27 = smov 0  }
   0x9 LB: > { %s2246_s28 = sadd.s32 4294967295, %s2159_s27   ;;  %s1858_s29 = sadd.s32 4294967294, %s2159_s27   ;;  %s2159_s27 = sphi %s2231_s27, %s3011_s27   ;;  %s2155_s26 = sphi %s2229_s26, %s3010_s26   ;;  %s2151_s25 = sphi %s2227_s25, %s3009_s25   ;;  %s2147_s24 = sphi %s2225_s24, %s3008_s24  }
   0xa   : > { %p45_p0 = scmp.ne.s32.totalorder %s2151_s25, %s2147_s24  ;;  %p2986_p1 = scmp.eq.s32.totalorder %s2246_s28, 0 }
   0xb   : > { %p201_p3 = scmp.eq.s32.totalorder %s1858_s29, 1  ;;  %p1859_p5 = scmp.ge.s32.totalorder %s2159_s27, 1 }
   0xc   : > { %p2255_p4 = por %p2986_p1, %p45_p0  ;;  %p208_p7 = scmp.lt.s32.totalorder %s2159_s27, 3 }
   0xd   : > { %p2260_p6 = por %p201_p3, %p45_p0  ;;  %s2161_s10 = smov [#allocation5]  }
   0xe   : > { %s2991_s30 = scalar_select %p2255_p4, 1, 0 }
   0xf   : > { %s2992_s8 = scalar_select %p2260_p6, 1, 0 }
  0x10   : > { %p2265_p8 = pnand %p1859_p5, %p208_p7  ;;  %s226_s11 = sshll.u32 %s2161_s10, 4  ;;  %s227_s11 = int_to_ptr.vmem [resolvable:$true] %s226_s11 }
  0x11   : > { %s2162_s13 = smov [#allocation7]   ;;  %s1992_s15 = scalar_lea.vmem %s227_s11, 256 }
  0x12   : > { %s2993_s9 = scalar_select %p2265_p8, 1, 0 }
  0x13   : > { %p1899_p9 = pneg %p2265_p8  ;;  %s242_s14 = sshll.u32 %s2162_s13, 4  ;;  %s243_s14 = int_to_ptr.vmem [resolvable:$true] %s242_s14 }
  0x14   : > { %p1993_p13 = scmp.ne.s32.totalorder %s227_s11, %s1992_s15  ;;  %p2000_p5 = scmp.lt.s32.totalorder %s227_s11, %s227_s11 }
  0x15   : > { %p2274_p11 = pnand %p1899_p9, %p2986_p1  ;;  %p2001_p7 = scmp.lt.s32.totalorder %s1992_s15, %s1992_s15 }
  0x17   : > { %p1983_p12 = pneg %p2274_p11  ;;  %p2002_p10 = por %p2001_p7, %p2000_p5 }
  0x19   : > { %p1995_p0 = pnand %p1993_p13, %p1983_p12 }
  0x1b   : > { %p1996_p3 = pneg %p1995_p0 }
  0x1d   : > { %p2003_p9 = pnand %p2002_p10, %p1996_p3 }
  0x1f   : > { %2006 = shalt.err (!%p2003_p9)
}
  0x20   : > { %s2163_s16 = smov 128   ;;  %s2164_s17 = smov 8  }
  0x21   : > { %s2995_s3 = sld [smem:[#allocation15_spill]]  ;;  %s2018_s20 = scalar_lea.vmem %s243_s14, 288 }
  0x22   : > { %p2019_p1 = scmp.ne.s32.totalorder %s243_s14, %s2018_s20  ;;  %p2026_p2 = scmp.lt.s32.totalorder %s243_s14, %s243_s14 }
  0x23   : > { %p2027_p6 = scmp.lt.s32.totalorder %s2018_s20, %s2018_s20 }
  0x24   : > { %p2021_p13 = pnand %p2019_p1, %p1983_p12 }
  0x25   : > { %p2028_p5 = por %p2027_p6, %p2026_p2 }
  0x26   : > { %p2022_p0 = pneg %p2021_p13 }
  0x27   : > { %1902 = dma.hbm_to_vmem [thread:$0]  (!%p2274_p11), %s2995_s3, 256, %s227_s11, [#allocation6], %s2163_s16, %s2163_s16, %s2164_s17  }
  0x28   : > { %p2029_p10 = pnand %p2028_p5, %p2022_p0 }
  0x2a   : > { %2032 = shalt.err (!%p2029_p10)
}
  0x2b   : > { %s2165_s21 = smov 32   ;;  %s2166_s22 = smov 2  }
  0x2c   : > { %1905 = dma.hbm_to_vmem [thread:$0]  (!%p2274_p11), %s2983_s5, 288, %s243_s14, [#allocation6], %s2165_s21, %s2165_s21, %s2166_s22  }
  0x2d   : > { %s2167_s10 = smov [#allocation8]  }
  0x2e   : > { %s255_s11 = sshll.u32 %s2167_s10, 4  ;;  %s256_s11 = int_to_ptr.vmem [resolvable:$true] %s255_s11 }
  0x2f   : > { %s2044_s13 = scalar_lea.vmem %s256_s11, 16384  ;;  %p2052_p6 = scmp.lt.s32.totalorder %s256_s11, %s256_s11 }
  0x30   : > { %p2045_p1 = scmp.ne.s32.totalorder %s256_s11, %s2044_s13  ;;  %p2053_p7 = scmp.lt.s32.totalorder %s2044_s13, %s2044_s13 }
  0x32   : > { %p2047_p3 = pnand %p2045_p1, %p1983_p12  ;;  %p2054_p9 = por %p2053_p7, %p2052_p6 }
  0x34   : > { %p2048_p2 = pneg %p2047_p3 }
  0x36   : > { %p2055_p13 = pnand %p2054_p9, %p2048_p2 }
  0x38   : > { %2058 = shalt.err (!%p2055_p13)
}
  0x39   : > { %s2168_s15 = smov 512   ;;  %s2305_s14 = sadd.s32 1, %s2159_s27  }
  0x3a   : > { %1908 = dma.hbm_to_vmem [thread:$0]  (!%p2274_p11), %s2984_s6, 16384, %s256_s11, [#allocation9], %s2168_s15, %s2168_s15, %s2165_s21  }
  0x3b   : > { %s32_s18 = sadd.s32 1, %s2155_s26  ;;  %s29_s12 = ssub.s32 %s2159_s27, %s2305_s14 }
  0x3c   : > { %p39_p12 = scmp.ne.s32.totalorder %s2155_s26, %s2151_s25  ;;  %p30_p0 = scmp.eq.s32.totalorder %s29_s12, 0 }
  0x3d   : > { %p40_p5 = scmp.eq.s32.totalorder %s2159_s27, 0  ;;  %p2996_p10 = scmp.eq.s32.totalorder %s2246_s28, 1 }
  0x3e   : > { %p1920_p3 = scmp.lt.s32.totalorder %s2159_s27, 2  ;;  %s269_s22 = sand.u32 1, %s2155_s26  }
  0x3f   : > { %p2315_p1 = por %p2996_p10, %p39_p12  ;;  %p41_p2 = por %p40_p5, %p39_p12 }
  0x40   : > { %s2321_s20 = scalar_select %p30_p0, %s2155_s26, %s32_s18  }
  0x41   : > { %s2997_s19 = scalar_select %p2315_p1, 1, 0 }
  0x42   : > { %s1864_s23 = sshll.u32 %s269_s22, 6  ;;  %s1881_s21 = sshll.u32 %s2159_s27, 10 }
  0x43   : > { %s2328_s11 = scalar_lea.hbm %s2978_s0, %s1881_s21  ;;  %s273_s13 = scalar_lea.vmem [#allocation2], %s1864_s23 }
  0x44   : > { %s280_s15 = sshll.u32 %s273_s13, 4  ;;  %p2332_p11 = pnand %p1920_p3, %p41_p2  ;;  %s2330_s15 = int_to_ptr.vmem [resolvable:$true] %s280_s15 }
  0x45   : > { %s2336_s17 = scalar_lea.sflag [#allocation3], %s269_s22  ;;  %s2059_s18 = scalar_lea.hbm %s2328_s11, 1024 }
  0x46   : > { %p2060_p6 = scmp.ne.s32.totalorder %s2328_s11, %s2059_s18  ;;  %p2061_p7 = pneg %p2332_p11 }
  0x47   : > { %s2064_s23 = scalar_lea.hbm %s2978_s0, 2048  ;;  %p2065_p12 = scmp.lt.s32.totalorder %s2328_s11, %s2978_s0 }
  0x48   : > { %p2062_p9 = pnand %p2061_p7, %p2060_p6  ;;  %p2066_p0 = scmp.lt.s32.totalorder %s2064_s23, %s2059_s18 }
  0x4a   : > { %p2063_p13 = pneg %p2062_p9  ;;  %p2067_p5 = por %p2066_p0, %p2065_p12 }
  0x4c   : > { %p2068_p10 = pnand %p2067_p5, %p2063_p13 }
  0x4e   : > { %2071 = shalt.err (!%p2068_p10)
}
  0x4f   : > { %s2072_s22 = scalar_lea.vmem %s2330_s15, 1024  ;;  %s2169_s13 = smov [#allocation2]  }
  0x50   : > { %p2073_p3 = scmp.ne.s32.totalorder %s2330_s15, %s2072_s22  ;;  %s2077_s3 = sshll.u32 %s2169_s13, 4  ;;  %s2078_s3 = int_to_ptr.vmem [resolvable:$false] %s2077_s3 }
  0x51   : > { %s2079_s12 = scalar_lea.vmem %s2078_s3, 2048  ;;  %p2080_p9 = scmp.lt.s32.totalorder %s2330_s15, %s2078_s3 }
  0x52   : > { %p2075_p2 = pnand %p2073_p3, %p2061_p7  ;;  %p2081_p1 = scmp.lt.s32.totalorder %s2079_s12, %s2072_s22 }
  0x54   : > { %p2076_p6 = pneg %p2075_p2  ;;  %p2082_p4 = por %p2081_p1, %p2080_p9 }
  0x56   : > { %p2083_p8 = pnand %p2082_p4, %p2076_p6 }
  0x58   : > { %2086 = shalt.err (!%p2083_p8)
}
  0x59   : > { %s2170_s18 = smov 256   ;;  %s2171_s21 = smov 16  }
  0x5a   : > { %1912 = dma.hbm_to_vmem [thread:$0]  (!%p2332_p11), %s2328_s11, 1024, %s2330_s15, %s2336_s17, %s2170_s18, %s2170_s18, %s2171_s21  }
  0x5b   : > { %p2999_p7 = scmp.ne.s32.totalorder %s2993_s9, 0 }
  0x5c   : > { %s2360_s23 = sand.u32 (!%p2999_p7), 1, %s2151_s25   ;;  %p3000_p4 = scmp.ne.s32.totalorder (!%p2999_p7), %s2991_s30, 0 }
  0x5d   : > { %292 = sbr.rel (%p2999_p7) target bundleno = 1180 (0x49c), region = 48  ;;  %s1868_s3 = sshll.u32 (!%p2999_p7), %s2360_s23, 6 }
  0x5e   : > { %s295_s29 = scalar_lea.sflag (!%p2999_p7), [#allocation3], %s2360_s23  ;;  %s298_s10 = scalar_lea.vmem (!%p2999_p7), [#allocation2], %s1868_s3 }
  0x62   : > { %2130 = dma.done.wait (%p3000_p4), %s295_s29, 1024  }
  0x63   : > { %2132 = vsyncadd (%p3000_p4), %s295_s29, 4294966272  ;;  %p3001_p8 = scmp.eq.s32.totalorder %s2246_s28, 0 }
  0x65   : > { %2134 = dma.done.wait (%p3001_p8), [#allocation6], 544   ;;  %p3002_p1 = pmov %p3001_p8 }
  0x67   : > { %2136 = vsyncadd (%p3002_p1), [#allocation6], 4294966752  ;;  %p3003_p11 = pmov %p3002_p1 }
  0x68   : > { %p3004_p13 = pmov %p3002_p1 }
  0x69   : > { %2138 = dma.done.wait (%p3003_p11), [#allocation9], 16384  }
  0x6a   : > { %2140 = vsyncadd (%p3004_p13), [#allocation9], 4294950912  ;;  %v2376_v0 = vld [vmem:[%s298_s10 + $0x30] sm:$0xff]  ;;  %v2378_v1 = vld [vmem:[%s298_s10 + $0x20] sm:$0xff]  ;;  %s2172_s9 = smov 1   ;;  %s2173_s30 = smov 15   ;;  %v765_v8 = vlaneseq }
  0x6b   : > { %889 = vrot.lane.b32.xlu0 %v2376_v0, %s2172_s9  ;;  %887 = vrot.lane.b32.xlu1 %v2378_v1, %s2172_s9  ;;  %v2384_v2 = vld [vmem:[%s298_s10 + $0x38] sm:$0xff]  ;;  %v2386_v3 = vld [vmem:[%s298_s10 + $0x28] sm:$0xff]  ;;  %s2174_s11 = smov 16   ;;  %s2175_s15 = smov 17   ;;  %v344_v14 = vld [vmem:[#allocation7 + $0x6] sm:$0x3] }
  0x6c   : > { %v2392_v4 = vld [vmem:[%s298_s10 + $0x18] sm:$0xff]  ;;  %v2394_v5 = vld [vmem:[%s298_s10 + $0x10] sm:$0xff]  ;;  %v2400_v6 = vld [vmem:[%s298_s10 + $0x8] sm:$0xff]  ;;  %s2176_s16 = smov 112   ;;  %s2177_s17 = smov 113   ;;  %v778_v9 = vshrl.u32 %v765_v8, 7 }
  0x6d   : > { %v2402_v7 = vld [vmem:[%s298_s10] sm:$0xff]  ;;  %s2178_s22 = smov 127   ;;  %v358_v10 = vld [vmem:[%s2979_s1 + $0x8] sm:$0xff]  ;;  %s2179_s18 = smov 111   ;;  %v2511_v11 = vand.u32 127, %v765_v8  ;;  %v2180_v19 = vmov 0.0  }
  0x6e   : > { %v2513_v12 = vsub.s32 1, %v778_v9  ;;  %v2515_v13 = vsub.s32 0, %v778_v9  ;;  %1176 = vmatprep.mubr.f32.mxu0 %v358_v10  ;;  %1247 = vmatprep.mubr.f32.mxu1 %v2180_v19  ;;  %v2181_v20 = vmov 0   ;;  %v343_v37 = vld [vmem:[#allocation7 + $0x4] sm:$0x3]  ;;  %v360_v38 = vld [vmem:[%s2980_s2] sm:$0xff] }
  0x6f   : > { %897 = vrot.lane.b32.xlu0 %v2384_v2, %s2172_s9  ;;  %895 = vrot.lane.b32.xlu1 %v2386_v3, %s2172_s9  ;;  %vm899_vm0 = vcmp.lt.s32.totalorder %v2511_v11, 1  ;;  %vm855_vm1 = vcmp.lt.s32.totalorder %v2511_v11, 15  ;;  %v342_v9 = vld [vmem:[#allocation7 + $0x2] sm:$0x3]  ;;  %vm811_vm2 = vcmp.lt.s32.totalorder %v2511_v11, 16  ;;  %vm767_vm3 = vcmp.lt.s32.totalorder %v2511_v11, 17 }
  0x70   : > { %v2523_v17 = vrot.slane %v344_v14, %v2513_v12  ;;  %v2526_v18 = vrot.slane %v344_v14, %v2515_v13  ;;  %1979 = vset.pattern.permute.xlu0 %v2181_v20  ;;  %1980 = vset.pattern.permute.xlu1 %v2181_v20  ;;  %v2563_v43 = vrot.slane %v343_v37, %v2515_v13  ;;  %vm1031_vm4 = vcmp.lt.s32.totalorder %v2511_v11, 112  ;;  %p3005_p0 = scmp.ne.s32.totalorder %s2997_s19, 0  ;;  %s2182_s13 = smov [#allocation10]  }
  0x71   : > { %v2569_v46 = vrot.slane %v343_v37, %v2513_v12  ;;  %vm987_vm5 = vcmp.lt.s32.totalorder %v2511_v11, 113  ;;  %vm943_vm6 = vcmp.lt.s32.totalorder %v2511_v11, 127  ;;  %vm1075_vm7 = vcmp.lt.s32.totalorder %v2511_v11, 111  ;;  %s2091_s12 = sshll.u32 %s2182_s13, 4  ;;  %s2092_s12 = int_to_ptr.vmem [resolvable:$false] %s2091_s12 }
  0x72   : > { %vm1108_vm8 = vcmask 261120   ;;  %vm1330_vm9 = vcmask 588800  }
  0x73   : > { %893 = vrot.lane.b32.xlu1 %v2392_v4, %s2172_s9  ;;  %885 = vrot.lane.b32.xlu0 %v2394_v5, %s2172_s9 }
  0x77   : > { %891 = vrot.lane.b32.xlu1 %v2400_v6, %s2172_s9  ;;  %883 = vrot.lane.b32.xlu0 %v2402_v7, %s2172_s9 }
  0x7b   : > { %853 = vrot.lane.b32.xlu1 %v2384_v2, %s2173_s30  ;;  %845 = vrot.lane.b32.xlu0 %v2376_v0, %s2173_s30 }
  0x7f   : > { %851 = vrot.lane.b32.xlu1 %v2386_v3, %s2173_s30  ;;  %843 = vrot.lane.b32.xlu0 %v2378_v1, %s2173_s30 }
  0x83   : > { %849 = vrot.lane.b32.xlu1 %v2392_v4, %s2173_s30  ;;  %841 = vrot.lane.b32.xlu0 %v2394_v5, %s2173_s30 }
  0x87   : > { %847 = vrot.lane.b32.xlu1 %v2400_v6, %s2173_s30  ;;  %839 = vrot.lane.b32.xlu0 %v2402_v7, %s2173_s30 }
  0x8b   : > { %809 = vrot.lane.b32.xlu1 %v2384_v2, %s2174_s11  ;;  %801 = vrot.lane.b32.xlu0 %v2376_v0, %s2174_s11 }
  0x8f   : > { %807 = vrot.lane.b32.xlu1 %v2386_v3, %s2174_s11  ;;  %799 = vrot.lane.b32.xlu0 %v2378_v1, %s2174_s11 }
  0x93   : > { %805 = vrot.lane.b32.xlu1 %v2392_v4, %s2174_s11  ;;  %797 = vrot.lane.b32.xlu0 %v2394_v5, %s2174_s11 }
  0x97   : > { %803 = vrot.lane.b32.xlu1 %v2400_v6, %s2174_s11  ;;  %795 = vrot.lane.b32.xlu0 %v2402_v7, %s2174_s11 }
  0x9b   : > { %763 = vrot.lane.b32.xlu1 %v2384_v2, %s2175_s15  ;;  %755 = vrot.lane.b32.xlu0 %v2376_v0, %s2175_s15 }
  0x9f   : > { %761 = vrot.lane.b32.xlu1 %v2386_v3, %s2175_s15  ;;  %753 = vrot.lane.b32.xlu0 %v2378_v1, %s2175_s15 }
  0xa3   : > { %759 = vrot.lane.b32.xlu1 %v2392_v4, %s2175_s15  ;;  %751 = vrot.lane.b32.xlu0 %v2394_v5, %s2175_s15 }
  0xa7   : > { %757 = vrot.lane.b32.xlu1 %v2400_v6, %s2175_s15  ;;  %749 = vrot.lane.b32.xlu0 %v2402_v7, %s2175_s15 }
  0xab   : > { %1029 = vrot.lane.b32.xlu1 %v2384_v2, %s2176_s16  ;;  %1021 = vrot.lane.b32.xlu0 %v2376_v0, %s2176_s16 }
  0xaf   : > { %1027 = vrot.lane.b32.xlu1 %v2386_v3, %s2176_s16  ;;  %1019 = vrot.lane.b32.xlu0 %v2378_v1, %s2176_s16 }
  0xb3   : > { %1025 = vrot.lane.b32.xlu1 %v2392_v4, %s2176_s16  ;;  %1017 = vrot.lane.b32.xlu0 %v2394_v5, %s2176_s16 }
  0xb7   : > { %1023 = vrot.lane.b32.xlu1 %v2400_v6, %s2176_s16  ;;  %1015 = vrot.lane.b32.xlu0 %v2402_v7, %s2176_s16 }
  0xbb   : > { %985 = vrot.lane.b32.xlu1 %v2384_v2, %s2177_s17  ;;  %977 = vrot.lane.b32.xlu0 %v2376_v0, %s2177_s17 }
  0xbf   : > { %983 = vrot.lane.b32.xlu1 %v2386_v3, %s2177_s17  ;;  %975 = vrot.lane.b32.xlu0 %v2378_v1, %s2177_s17 }
  0xc3   : > { %981 = vrot.lane.b32.xlu1 %v2392_v4, %s2177_s17  ;;  %973 = vrot.lane.b32.xlu0 %v2394_v5, %s2177_s17 }
  0xc7   : > { %979 = vrot.lane.b32.xlu1 %v2400_v6, %s2177_s17  ;;  %971 = vrot.lane.b32.xlu0 %v2402_v7, %s2177_s17 }
  0xcb   : > { %941 = vrot.lane.b32.xlu1 %v2384_v2, %s2178_s22  ;;  %933 = vrot.lane.b32.xlu0 %v2376_v0, %s2178_s22 }
  0xcf   : > { %939 = vrot.lane.b32.xlu1 %v2386_v3, %s2178_s22  ;;  %931 = vrot.lane.b32.xlu0 %v2378_v1, %s2178_s22 }
  0xd3   : > { %937 = vrot.lane.b32.xlu1 %v2392_v4, %s2178_s22  ;;  %929 = vrot.lane.b32.xlu0 %v2394_v5, %s2178_s22 }
  0xd7   : > { %935 = vrot.lane.b32.xlu1 %v2400_v6, %s2178_s22  ;;  %927 = vrot.lane.b32.xlu0 %v2402_v7, %s2178_s22 }
  0xdb   : > { %1073 = vrot.lane.b32.xlu1 %v2384_v2, %s2179_s18  ;;  %1065 = vrot.lane.b32.xlu0 %v2376_v0, %s2179_s18 }
  0xdd   : > { %v890_v15 = vpop.permute.xlu0 %889  ;;  %v888_v16 = vpop.permute.xlu1 %887 }
  0xdf   : > { %1071 = vrot.lane.b32.xlu1 %v2386_v3, %s2179_s18  ;;  %1063 = vrot.lane.b32.xlu0 %v2378_v1, %s2179_s18 }
  0xe1   : > { %v898_v21 = vpop.permute.xlu0 %897  ;;  %v896_v22 = vpop.permute.xlu1 %895 }
  0xe2   : > { %v907_v23 = vsel %vm899_vm0, %v898_v21, %v890_v15  ;;  %v903_v24 = vsel %vm899_vm0, %v890_v15, %v898_v21  ;;  %v902_v25 = vsel %vm899_vm0, %v888_v16, %v896_v22  ;;  %v906_v27 = vsel %vm899_vm0, %v896_v22, %v888_v16 }
  0xe3   : > { %1069 = vrot.lane.b32.xlu1 %v2392_v4, %s2179_s18  ;;  %1061 = vrot.lane.b32.xlu0 %v2394_v5, %s2179_s18  ;;  %v926_v26 = vmul.f32 %v2523_v17, %v903_v24  ;;  %v925_v28 = vmul.f32 %v2526_v18, %v907_v23  ;;  %v924_v31 = vmul.f32 %v2523_v17, %v902_v25 }
  0xe4   : > { %v923_v34 = vmul.f32 %v2526_v18, %v906_v27  ;;  %v2597_v22 = vrot.slane %v342_v9, %v2515_v13  ;;  %v2600_v23 = vrot.slane %v342_v9, %v2513_v12 }
  0xe5   : > { %v894_v29 = vpop.permute.xlu1 %893  ;;  %v886_v30 = vpop.permute.xlu0 %885  ;;  %1112 = vmatprep.subr.mxu0 %v926_v26 }
  0xe6   : > { %v901_v32 = vsel %vm899_vm0, %v886_v30, %v894_v29  ;;  %v905_v33 = vsel %vm899_vm0, %v894_v29, %v886_v30  ;;  %1113 = vmatpush1.msra.mxu0 %v925_v28 }
  0xe7   : > { %v921_v35 = vmul.f32 %v2526_v18, %v905_v33  ;;  %v922_v36 = vmul.f32 %v2523_v17, %v901_v32  ;;  %1067 = vrot.lane.b32.xlu1 %v2400_v6, %s2179_s18  ;;  %1059 = vrot.lane.b32.xlu0 %v2402_v7, %s2179_s18 }
  0xe8   : > { %1114 = vmatprep.subr.mxu0 %v924_v31 }
  0xe9   : > { %1115 = vmatpush1.msra.mxu0 %v923_v34  ;;  %v892_v39 = vpop.permute.xlu1 %891  ;;  %v884_v40 = vpop.permute.xlu0 %883 }
  0xea   : > { %v900_v41 = vsel %vm899_vm0, %v884_v40, %v892_v39  ;;  %v904_v42 = vsel %vm899_vm0, %v892_v39, %v884_v40  ;;  %1116 = vmatprep.subr.mxu0 %v922_v36 }
  0xeb   : > { %v919_v44 = vmul.f32 %v2526_v18, %v904_v42  ;;  %v920_v45 = vmul.f32 %v2523_v17, %v900_v41  ;;  %1117 = vmatpush1.msra.mxu0 %v921_v35  ;;  %1105 = vperm.xlu0 %1979, %v360_v38   ;;  %v341_v42 = vld [vmem:[#allocation7] sm:$0x3] }
  0xed   : > { %v854_v47 = vpop.permute.xlu1 %853  ;;  %v846_v48 = vpop.permute.xlu0 %845  ;;  %1118 = vmatprep.subr.mxu0 %v920_v45 }
  0xee   : > { %v859_v49 = vsel %vm855_vm1, %v846_v48, %v854_v47  ;;  %v863_v50 = vsel %vm855_vm1, %v854_v47, %v846_v48  ;;  %1119 = vmatpush1.msra.mxu0 %v919_v44 }
  0xef   : > { %v881_v51 = vmul.f32 %v2563_v43, %v863_v50  ;;  %v882_v52 = vmul.f32 %v2569_v46, %v859_v49 }
  0xf1   : > { %v852_v53 = vpop.permute.xlu1 %851  ;;  %v844_v54 = vpop.permute.xlu0 %843  ;;  %1120 = vmatprep.subr.mxu0 %v882_v52  ;;  %v2631_v52 = vrot.slane %v341_v42, %v2513_v12 }
  0xf2   : > { %v858_v55 = vsel %vm855_vm1, %v844_v54, %v852_v53  ;;  %v862_v56 = vsel %vm855_vm1, %v852_v53, %v844_v54  ;;  %1121 = vmatpush1.msra.mxu0 %v881_v51  ;;  %v2628_v51 = vrot.slane %v341_v42, %v2515_v13 }
  0xf3   : > { %v879_v57 = vmul.f32 %v2563_v43, %v862_v56  ;;  %v880_v58 = vmul.f32 %v2569_v46, %v858_v55 }
  0xf5   : > { %v850_v59 = vpop.permute.xlu1 %849  ;;  %v842_v60 = vpop.permute.xlu0 %841  ;;  %1122 = vmatprep.subr.mxu0 %v880_v58 }
  0xf6   : > { %v857_v61 = vsel %vm855_vm1, %v842_v60, %v850_v59  ;;  %v861_v62 = vsel %vm855_vm1, %v850_v59, %v842_v60  ;;  %1123 = vmatpush1.msra.mxu0 %v879_v57 }
  0xf7   : > { %v877_v63 = vmul.f32 %v2563_v43, %v861_v62  ;;  %v878_v8 = vmul.f32 %v2569_v46, %v857_v61 }
  0xf9   : > { %v848_v10 = vpop.permute.xlu1 %847  ;;  %v840_v14 = vpop.permute.xlu0 %839  ;;  %1124 = vmatprep.subr.mxu0 %v878_v8 }
  0xfa   : > { %v856_v15 = vsel %vm855_vm1, %v840_v14, %v848_v10  ;;  %v860_v16 = vsel %vm855_vm1, %v848_v10, %v840_v14  ;;  %1125 = vmatpush1.msra.mxu0 %v877_v63 }
  0xfb   : > { %v875_v20 = vmul.f32 %v2563_v43, %v860_v16  ;;  %v876_v21 = vmul.f32 %v2569_v46, %v856_v15 }
  0xfd   : > { %v810_v24 = vpop.permute.xlu1 %809  ;;  %v802_v25 = vpop.permute.xlu0 %801  ;;  %1126 = vmatprep.subr.mxu0 %v876_v21  ;;  %v347_v21 = vld [vmem:[#allocation7 + $0xe] sm:$0x3] }
  0xfe   : > { %v815_v26 = vsel %vm811_vm2, %v802_v25, %v810_v24  ;;  %v819_v27 = vsel %vm811_vm2, %v810_v24, %v802_v25  ;;  %1127 = vmatpush1.msra.mxu0 %v875_v20 }
  0xff   : > { %v837_v28 = vmul.f32 %v2597_v22, %v819_v27  ;;  %v838_v29 = vmul.f32 %v2600_v23, %v815_v26 }
 0x101   : > { %v808_v30 = vpop.permute.xlu1 %807  ;;  %v800_v31 = vpop.permute.xlu0 %799  ;;  %1128 = vmatprep.subr.mxu0 %v838_v29 }
 0x102   : > { %v814_v32 = vsel %vm811_vm2, %v800_v31, %v808_v30  ;;  %v818_v33 = vsel %vm811_vm2, %v808_v30, %v800_v31  ;;  %1129 = vmatpush1.msra.mxu0 %v837_v28  ;;  %v2659_v30 = vrot.slane %v347_v21, %v2515_v13  ;;  %v2662_v31 = vrot.slane %v347_v21, %v2513_v12 }
 0x103   : > { %v835_v34 = vmul.f32 %v2597_v22, %v818_v33  ;;  %v836_v35 = vmul.f32 %v2600_v23, %v814_v32 }
 0x105   : > { %v806_v36 = vpop.permute.xlu1 %805  ;;  %v798_v37 = vpop.permute.xlu0 %797  ;;  %1130 = vmatprep.subr.mxu0 %v836_v35 }
 0x106   : > { %v813_v38 = vsel %vm811_vm2, %v798_v37, %v806_v36  ;;  %v817_v39 = vsel %vm811_vm2, %v806_v36, %v798_v37  ;;  %1131 = vmatpush1.msra.mxu0 %v835_v34 }
 0x107   : > { %v833_v40 = vmul.f32 %v2597_v22, %v817_v39  ;;  %v834_v41 = vmul.f32 %v2600_v23, %v813_v38 }
 0x109   : > { %v804_v44 = vpop.permute.xlu1 %803  ;;  %v796_v45 = vpop.permute.xlu0 %795  ;;  %1132 = vmatprep.subr.mxu0 %v834_v41 }
 0x10a   : > { %v812_v47 = vsel %vm811_vm2, %v796_v45, %v804_v44  ;;  %v816_v48 = vsel %vm811_vm2, %v804_v44, %v796_v45  ;;  %1133 = vmatpush1.msra.mxu0 %v833_v40 }
 0x10b   : > { %v831_v49 = vmul.f32 %v2597_v22, %v816_v48  ;;  %v832_v50 = vmul.f32 %v2600_v23, %v812_v47 }
 0x10d   : > { %v764_v53 = vpop.permute.xlu1 %763  ;;  %v756_v54 = vpop.permute.xlu0 %755  ;;  %1134 = vmatprep.subr.mxu0 %v832_v50 }
 0x10e   : > { %v771_v55 = vsel %vm767_vm3, %v756_v54, %v764_v53  ;;  %v775_v56 = vsel %vm767_vm3, %v764_v53, %v756_v54  ;;  %1135 = vmatpush1.msra.mxu0 %v831_v49  ;;  %v346_v54 = vld [vmem:[#allocation7 + $0xc] sm:$0x3] }
 0x10f   : > { %v793_v57 = vmul.f32 %v2628_v51, %v775_v56  ;;  %v794_v58 = vmul.f32 %v2631_v52, %v771_v55 }
 0x111   : > { %v762_v59 = vpop.permute.xlu1 %761  ;;  %v754_v60 = vpop.permute.xlu0 %753  ;;  %1136 = vmatprep.subr.mxu0 %v794_v58 }
 0x112   : > { %v770_v61 = vsel %vm767_vm3, %v754_v60, %v762_v59  ;;  %v774_v62 = vsel %vm767_vm3, %v762_v59, %v754_v60  ;;  %1137 = vmatpush1.msra.mxu0 %v793_v57 }
 0x113   : > { %v791_v63 = vmul.f32 %v2628_v51, %v774_v62  ;;  %v792_v8 = vmul.f32 %v2631_v52, %v770_v61  ;;  %v2690_v61 = vrot.slane %v346_v54, %v2515_v13  ;;  %v2693_v62 = vrot.slane %v346_v54, %v2513_v12 }
 0x115   : > { %v760_v9 = vpop.permute.xlu1 %759  ;;  %v752_v10 = vpop.permute.xlu0 %751  ;;  %1138 = vmatprep.subr.mxu0 %v792_v8 }
 0x116   : > { %v769_v14 = vsel %vm767_vm3, %v752_v10, %v760_v9  ;;  %v773_v15 = vsel %vm767_vm3, %v760_v9, %v752_v10  ;;  %1139 = vmatpush1.msra.mxu0 %v791_v63 }
 0x117   : > { %v789_v16 = vmul.f32 %v2628_v51, %v773_v15  ;;  %v790_v20 = vmul.f32 %v2631_v52, %v769_v14 }
 0x119   : > { %v758_v24 = vpop.permute.xlu1 %757  ;;  %v750_v25 = vpop.permute.xlu0 %749  ;;  %1140 = vmatprep.subr.mxu0 %v790_v20 }
 0x11a   : > { %v768_v26 = vsel %vm767_vm3, %v750_v25, %v758_v24  ;;  %v772_v27 = vsel %vm767_vm3, %v758_v24, %v750_v25  ;;  %1141 = vmatpush1.msra.mxu0 %v789_v16 }
 0x11b   : > { %v787_v28 = vmul.f32 %v2628_v51, %v772_v27  ;;  %v788_v29 = vmul.f32 %v2631_v52, %v768_v26 }
 0x11d   : > { %v1030_v32 = vpop.permute.xlu1 %1029  ;;  %v1022_v33 = vpop.permute.xlu0 %1021  ;;  %1142 = vmatprep.subr.mxu0 %v788_v29 }
 0x11e   : > { %v1035_v34 = vsel %vm1031_vm4, %v1022_v33, %v1030_v32  ;;  %v1039_v35 = vsel %vm1031_vm4, %v1030_v32, %v1022_v33  ;;  %1143 = vmatpush1.msra.mxu0 %v787_v28 }
 0x11f   : > { %v1057_v36 = vmul.f32 %v2659_v30, %v1035_v34  ;;  %v1058_v37 = vmul.f32 %v2662_v31, %v1039_v35  ;;  %v345_v35 = vld [vmem:[#allocation7 + $0xa] sm:$0x3] }
 0x121   : > { %v1028_v38 = vpop.permute.xlu1 %1027  ;;  %v1020_v39 = vpop.permute.xlu0 %1019  ;;  %1144 = vmatprep.subr.mxu0 %v1058_v37 }
 0x122   : > { %v1034_v40 = vsel %vm1031_vm4, %v1020_v39, %v1028_v38  ;;  %v1038_v41 = vsel %vm1031_vm4, %v1028_v38, %v1020_v39  ;;  %1145 = vmatpush2.msra.mxu0 %v1057_v36 }
 0x123   : > { %v1055_v42 = vmul.f32 %v2659_v30, %v1034_v40  ;;  %v1056_v44 = vmul.f32 %v2662_v31, %v1038_v41 }
 0x125   : > { %v1026_v45 = vpop.permute.xlu1 %1025  ;;  %v1018_v47 = vpop.permute.xlu0 %1017  ;;  %1146 = vmatprep.subr.mxu0 %v1056_v44  ;;  %v2724_v44 = vrot.slane %v345_v35, %v2513_v12 }
 0x126   : > { %v1033_v48 = vsel %vm1031_vm4, %v1018_v47, %v1026_v45  ;;  %v1037_v49 = vsel %vm1031_vm4, %v1026_v45, %v1018_v47  ;;  %1147 = vmatpush2.msra.mxu0 %v1055_v42  ;;  %v2721_v42 = vrot.slane %v345_v35, %v2515_v13 }
 0x127   : > { %v1053_v50 = vmul.f32 %v2659_v30, %v1033_v48  ;;  %v1054_v53 = vmul.f32 %v2662_v31, %v1037_v49 }
 0x129   : > { %v1024_v55 = vpop.permute.xlu1 %1023  ;;  %v1016_v56 = vpop.permute.xlu0 %1015  ;;  %1148 = vmatprep.subr.mxu0 %v1054_v53 }
 0x12a   : > { %v1032_v57 = vsel %vm1031_vm4, %v1016_v56, %v1024_v55  ;;  %v1036_v58 = vsel %vm1031_vm4, %v1024_v55, %v1016_v56  ;;  %1149 = vmatpush2.msra.mxu0 %v1053_v50 }
 0x12b   : > { %v1051_v59 = vmul.f32 %v2659_v30, %v1032_v57  ;;  %v1052_v60 = vmul.f32 %v2662_v31, %v1036_v58 }
 0x12d   : > { %v986_v63 = vpop.permute.xlu1 %985  ;;  %v978_v8 = vpop.permute.xlu0 %977  ;;  %1150 = vmatprep.subr.mxu0 %v1052_v60 }
 0x12e   : > { %v991_v9 = vsel %vm987_vm5, %v978_v8, %v986_v63  ;;  %v995_v10 = vsel %vm987_vm5, %v986_v63, %v978_v8  ;;  %1151 = vmatpush2.msra.mxu0 %v1051_v59 }
 0x12f   : > { %v1013_v14 = vmul.f32 %v2690_v61, %v991_v9  ;;  %v1014_v15 = vmul.f32 %v2693_v62, %v995_v10 }
 0x131   : > { %v984_v16 = vpop.permute.xlu1 %983  ;;  %v976_v20 = vpop.permute.xlu0 %975  ;;  %1152 = vmatprep.subr.mxu0 %v1014_v15  ;;  %v348_v15 = vld [vmem:[#allocation7 + $0x10] sm:$0x3] }
 0x132   : > { %v990_v21 = vsel %vm987_vm5, %v976_v20, %v984_v16  ;;  %v994_v24 = vsel %vm987_vm5, %v984_v16, %v976_v20  ;;  %1153 = vmatpush2.msra.mxu0 %v1013_v14 }
 0x133   : > { %v1011_v25 = vmul.f32 %v2690_v61, %v990_v21  ;;  %v1012_v26 = vmul.f32 %v2693_v62, %v994_v24 }
 0x135   : > { %v982_v27 = vpop.permute.xlu1 %981  ;;  %v974_v28 = vpop.permute.xlu0 %973  ;;  %1154 = vmatprep.subr.mxu0 %v1012_v26 }
 0x136   : > { %v989_v29 = vsel %vm987_vm5, %v974_v28, %v982_v27  ;;  %v993_v32 = vsel %vm987_vm5, %v982_v27, %v974_v28  ;;  %1155 = vmatpush2.msra.mxu0 %v1011_v25  ;;  %v2752_v27 = vrot.slane %v348_v15, %v2515_v13  ;;  %v2755_v28 = vrot.slane %v348_v15, %v2513_v12 }
 0x137   : > { %v1009_v33 = vmul.f32 %v2690_v61, %v989_v29  ;;  %v1010_v34 = vmul.f32 %v2693_v62, %v993_v32 }
 0x139   : > { %v980_v36 = vpop.permute.xlu1 %979  ;;  %v972_v37 = vpop.permute.xlu0 %971  ;;  %1156 = vmatprep.subr.mxu0 %v1010_v34 }
 0x13a   : > { %v988_v38 = vsel %vm987_vm5, %v972_v37, %v980_v36  ;;  %v992_v39 = vsel %vm987_vm5, %v980_v36, %v972_v37  ;;  %1157 = vmatpush2.msra.mxu0 %v1009_v33 }
 0x13b   : > { %v1007_v40 = vmul.f32 %v2690_v61, %v988_v38  ;;  %v1008_v41 = vmul.f32 %v2693_v62, %v992_v39 }
 0x13d   : > { %v942_v45 = vpop.permute.xlu1 %941  ;;  %v934_v47 = vpop.permute.xlu0 %933  ;;  %1158 = vmatprep.subr.mxu0 %v1008_v41 }
 0x13e   : > { %v947_v48 = vsel %vm943_vm6, %v934_v47, %v942_v45  ;;  %v951_v49 = vsel %vm943_vm6, %v942_v45, %v934_v47  ;;  %1159 = vmatpush2.msra.mxu0 %v1007_v40 }
 0x13f   : > { %v969_v50 = vmul.f32 %v2721_v42, %v947_v48  ;;  %v970_v53 = vmul.f32 %v2724_v44, %v951_v49 }
 0x141   : > { %v940_v54 = vpop.permute.xlu1 %939  ;;  %v932_v55 = vpop.permute.xlu0 %931  ;;  %1160 = vmatprep.subr.mxu0 %v970_v53 }
 0x142   : > { %v946_v56 = vsel %vm943_vm6, %v932_v55, %v940_v54  ;;  %v950_v57 = vsel %vm943_vm6, %v940_v54, %v932_v55  ;;  %1161 = vmatpush2.msra.mxu0 %v969_v50 }
 0x143   : > { %v967_v58 = vmul.f32 %v2721_v42, %v946_v56  ;;  %v968_v59 = vmul.f32 %v2724_v44, %v950_v57 }
 0x145   : > { %v938_v60 = vpop.permute.xlu1 %937  ;;  %v930_v63 = vpop.permute.xlu0 %929  ;;  %1162 = vmatprep.subr.mxu0 %v968_v59 }
 0x146   : > { %v945_v8 = vsel %vm943_vm6, %v930_v63, %v938_v60  ;;  %v949_v9 = vsel %vm943_vm6, %v938_v60, %v930_v63  ;;  %1163 = vmatpush2.msra.mxu0 %v967_v58 }
 0x147   : > { %v965_v10 = vmul.f32 %v2721_v42, %v945_v8  ;;  %v966_v14 = vmul.f32 %v2724_v44, %v949_v9 }
 0x149   : > { %v936_v16 = vpop.permute.xlu1 %935  ;;  %v928_v20 = vpop.permute.xlu0 %927  ;;  %1164 = vmatprep.subr.mxu0 %v966_v14  ;;  %v426_v14 = vld [vmem:[#allocation8 + $0x1e8] sm:$0xff] }
 0x14a   : > { %v944_v21 = vsel %vm943_vm6, %v928_v20, %v936_v16  ;;  %v948_v24 = vsel %vm943_vm6, %v936_v16, %v928_v20  ;;  %1165 = vmatpush2.msra.mxu0 %v965_v10  ;;  %v363_v10 = vld [vmem:[%s2982_s4] sm:$0xff]  ;;  %v615_v15 = vunpack.c.l.bf16 %v426_v14  ;;  %v616_v16 = vunpack.c.h.bf16 %v426_v14  ;;  %v422_v20 = vld [vmem:[#allocation8 + $0x1c8] sm:$0xff] }
 0x14b   : > { %v963_v25 = vmul.f32 %v2721_v42, %v944_v21  ;;  %v964_v26 = vmul.f32 %v2724_v44, %v948_v24  ;;  %v607_v21 = vunpack.c.l.bf16 %v422_v20  ;;  %v608_v24 = vunpack.c.h.bf16 %v422_v20  ;;  %v366_v14 = vld [vmem:[#allocation8 + $0x8] sm:$0xff] }
 0x14c   : > { %v490_v20 = vld [vmem:[#allocation8 + $0x3e8] sm:$0xff] }
 0x14d   : > { %v1074_v29 = vpop.permute.xlu1 %1073  ;;  %v1066_v32 = vpop.permute.xlu0 %1065  ;;  %1166 = vmatprep.subr.mxu0 %v964_v26  ;;  %v414_v26 = vld [vmem:[#allocation8 + $0x188] sm:$0xff] }
 0x14e   : > { %v1079_v33 = vsel %vm1075_vm7, %v1066_v32, %v1074_v29  ;;  %1167 = vmatpush2.msra.mxu0 %v963_v25  ;;  %v1083_v34 = vsel %vm1075_vm7, %v1074_v29, %v1066_v32  ;;  %v418_v25 = vld [vmem:[#allocation8 + $0x1a8] sm:$0xff] }
 0x14f   : > { %v1102_v35 = vmul.f32 %v2755_v28, %v1083_v34  ;;  %v1101_v36 = vmul.f32 %v2752_v27, %v1079_v33  ;;  %1168 = vmatprep.subr.mxu0 %v2384_v2  ;;  %v600_v29 = vunpack.c.h.bf16 %v418_v25  ;;  %v599_v32 = vunpack.c.l.bf16 %v418_v25  ;;  %v410_v33 = vld [vmem:[#allocation8 + $0x168] sm:$0xff] }
 0x150   : > { %1169 = vmatpush2.msra.mxu0 %v2376_v0  ;;  %v357_v0 = vld [vmem:[%s2979_s1] sm:$0xff]  ;;  %v364_v34 = vld [vmem:[%s2982_s4 + $0x8] sm:$0xff] }
 0x151   : > { %v1072_v12 = vpop.permute.xlu1 %1071  ;;  %v1064_v13 = vpop.permute.xlu0 %1063  ;;  %1207 = vmatprep.subr.mxu1 %v1102_v35  ;;  %1170 = vmatprep.subr.mxu0 %v2386_v3  ;;  %v592_v35 = vunpack.c.h.bf16 %v414_v26  ;;  %v486_v25 = vld [vmem:[#allocation8 + $0x3c8] sm:$0xff] }
 0x152   : > { %v1078_v37 = vsel %vm1075_vm7, %v1064_v13, %v1072_v12  ;;  %v1082_v38 = vsel %vm1075_vm7, %v1072_v12, %v1064_v13  ;;  %1208 = vmatpush1.msra.mxu1 %v1101_v36  ;;  %1171 = vmatpush2.msra.mxu0 %v2378_v1  ;;  %v591_v36 = vunpack.c.l.bf16 %v414_v26  ;;  %v406_v12 = vld [vmem:[#allocation8 + $0x148] sm:$0xff]  ;;  %v584_v13 = vunpack.c.h.bf16 %v410_v33 }
 0x153   : > { %v1099_v39 = vmul.f32 %v2752_v27, %v1078_v37  ;;  %v1100_v2 = vmul.f32 %v2755_v28, %v1082_v38  ;;  %1172 = vmatprep.subr.mxu0 %v2392_v4  ;;  %v583_v37 = vunpack.c.l.bf16 %v410_v33  ;;  %v402_v38 = vld [vmem:[#allocation8 + $0x128] sm:$0xff]  ;;  %v744_v26 = vunpack.c.h.bf16 %v490_v20 }
 0x154   : > { %1173 = vmatpush2.msra.mxu0 %v2394_v5  ;;  %v736_v33 = vunpack.c.h.bf16 %v486_v25 }
 0x155   : > { %v1070_v3 = vpop.permute.xlu1 %1069  ;;  %v1062_v40 = vpop.permute.xlu0 %1061  ;;  %1209 = vmatprep.subr.mxu1 %v1100_v2  ;;  %1174 = vmatprep.subr.mxu0 %v2400_v6  ;;  %v575_v2 = vunpack.c.l.bf16 %v406_v12 }
 0x156   : > { %v1077_v1 = vsel %vm1075_vm7, %v1062_v40, %v1070_v3  ;;  %v1081_v41 = vsel %vm1075_vm7, %v1070_v3, %v1062_v40  ;;  %1210 = vmatpush1.msra.mxu1 %v1099_v39  ;;  %1175 = vmatpush2.msra.mxu0 %v2402_v7  ;;  %v359_v7 = vld [vmem:[%s2979_s1 + $0x10] sm:$0xff]  ;;  %v576_v39 = vunpack.c.h.bf16 %v406_v12  ;;  %v568_v3 = vunpack.c.h.bf16 %v402_v38 }
 0x157   : > { %v1097_v4 = vmul.f32 %v2752_v27, %v1077_v1  ;;  %v1098_v5 = vmul.f32 %v2755_v28, %v1081_v41  ;;  %1177 = vmatmul.mubr.f32.vlgmr.msra.gmra.mxu0 %v357_v0  ;;  %1495 = vmatprep.subr.mxu0 %v616_v16  ;;  %v398_v0 = vld [vmem:[#allocation8 + $0x108] sm:$0xff]  ;;  %v567_v40 = vunpack.c.l.bf16 %v402_v38 }
 0x158   : > { %1496 = vmatpush1.msra.mxu0 %v615_v15  ;;  %v394_v1 = vld [vmem:[#allocation8 + $0xe8] sm:$0xff]  ;;  %v560_v41 = vunpack.c.h.bf16 %v398_v0 }
 0x159   : > { %v1068_v45 = vpop.permute.xlu1 %1067  ;;  %v1060_v47 = vpop.permute.xlu0 %1059  ;;  %1211 = vmatprep.subr.mxu1 %v1098_v5  ;;  %1497 = vmatprep.subr.mxu0 %v608_v24  ;;  %v390_v5 = vld [vmem:[#allocation8 + $0xc8] sm:$0xff]  ;;  %v495_v24 = vunpack.c.l.bf16 %v366_v14 }
 0x15a   : > { %v1076_v6 = vsel %vm1075_vm7, %v1060_v47, %v1068_v45  ;;  %v1080_v48 = vsel %vm1075_vm7, %v1068_v45, %v1060_v47  ;;  %1212 = vmatpush1.msra.mxu1 %v1097_v4  ;;  %1498 = vmatpush1.msra.mxu0 %v607_v21  ;;  %v559_v4 = vunpack.c.l.bf16 %v398_v0  ;;  %v552_v45 = vunpack.c.h.bf16 %v394_v1 }
 0x15b   : > { %v1095_v49 = vmul.f32 %v2752_v27, %v1076_v6  ;;  %v1096_v50 = vmul.f32 %v2755_v28, %v1080_v48  ;;  %1499 = vmatprep.subr.mxu0 %v600_v29  ;;  %v551_v47 = vunpack.c.l.bf16 %v394_v1  ;;  %v386_v6 = vld [vmem:[#allocation8 + $0xa8] sm:$0xff]  ;;  %v544_v48 = vunpack.c.h.bf16 %v390_v5 }
 0x15c   : > { %1500 = vmatpush1.msra.mxu0 %v599_v32  ;;  %v496_v21 = vunpack.c.h.bf16 %v366_v14  ;;  %v743_v29 = vunpack.c.l.bf16 %v490_v20  ;;  %v482_v32 = vld [vmem:[#allocation8 + $0x3a8] sm:$0xff] }
 0x15d   : > { %1213 = vmatprep.subr.mxu1 %v1096_v50  ;;  %1501 = vmatprep.subr.mxu0 %v592_v35  ;;  %v382_v50 = vld [vmem:[#allocation8 + $0x88] sm:$0xff]  ;;  %v727_v12 = vunpack.c.l.bf16 %v482_v32 }
 0x15e   : > { %1214 = vmatpush1.msra.mxu1 %v1095_v49  ;;  %1502 = vmatpush1.msra.mxu0 %v591_v36  ;;  %v543_v49 = vunpack.c.l.bf16 %v390_v5  ;;  %v478_v35 = vld [vmem:[#allocation8 + $0x388] sm:$0xff]  ;;  %v728_v36 = vunpack.c.h.bf16 %v482_v32 }
 0x15f   : > { %1873 = vmatmul.mubr.msk.f32.vlgmr.msra.gmra.mxu1 %vm1108_vm8, %v359_v7  ;;  %1503 = vmatprep.subr.mxu0 %v584_v13  ;;  %v536_v7 = vunpack.c.h.bf16 %v386_v6  ;;  %v474_v13 = vld [vmem:[#allocation8 + $0x368] sm:$0xff]  ;;  %v719_v38 = vunpack.c.l.bf16 %v478_v35 }
 0x160   : > { %1401 = vmatprep.mubr.f32.mxu1 %v2180_v19  ;;  %1504 = vmatpush1.msra.mxu0 %v583_v37  ;;  %v720_v37 = vunpack.c.h.bf16 %v478_v35  ;;  %v711_v0 = vunpack.c.l.bf16 %v474_v13 }
 0x161   : > { %1505 = vmatprep.subr.mxu0 %v576_v39  ;;  %v470_v39 = vld [vmem:[#allocation8 + $0x348] sm:$0xff] }
 0x162   : > { %1506 = vmatpush1.msra.mxu0 %v575_v2  ;;  %v712_v2 = vunpack.c.h.bf16 %v474_v13  ;;  %v703_v1 = vunpack.c.l.bf16 %v470_v39 }
 0x163   : > { %1507 = vmatprep.subr.mxu0 %v568_v3  ;;  %v466_v3 = vld [vmem:[#allocation8 + $0x328] sm:$0xff] }
 0x164   : > { %1508 = vmatpush1.msra.mxu0 %v567_v40  ;;  %v704_v40 = vunpack.c.h.bf16 %v470_v39  ;;  %v695_v5 = vunpack.c.l.bf16 %v466_v3 }
 0x165   : > { %1509 = vmatprep.subr.mxu0 %v560_v41  ;;  %v462_v41 = vld [vmem:[#allocation8 + $0x308] sm:$0xff] }
 0x166   : > { %v1106_v54 = vpop.permute.xlu0 %1105  ;;  %1510 = vmatpush1.msra.mxu0 %v559_v4  ;;  %v696_v4 = vunpack.c.h.bf16 %v466_v3 }
 0x167   : > { %1511 = vmatprep.subr.mxu0 %v552_v45  ;;  %v458_v45 = vld [vmem:[#allocation8 + $0x2e8] sm:$0xff] }
 0x168   : > { %1512 = vmatpush1.msra.mxu0 %v551_v47  ;;  %v688_v47 = vunpack.c.h.bf16 %v462_v41 }
 0x169   : > { %1513 = vmatprep.subr.mxu0 %v544_v48  ;;  %v454_v48 = vld [vmem:[#allocation8 + $0x2c8] sm:$0xff] }
 0x16a   : > { %1514 = vmatpush1.msra.mxu0 %v543_v49  ;;  %v680_v49 = vunpack.c.h.bf16 %v458_v45 }
 0x16b   : > { %1515 = vmatprep.subr.mxu0 %v536_v7  ;;  %v450_v7 = vld [vmem:[#allocation8 + $0x2a8] sm:$0xff] }
 0x217   : > { %v1178_v53 = vpop.f32.mrf.mxu0 }
 0x218   : > { %v1179_v55 = vadd.f32 %v1178_v53, %v1106_v54  ;;  %v535_v53 = vunpack.c.l.bf16 %v386_v6  ;;  %v687_v6 = vunpack.c.l.bf16 %v462_v41 }
 0x219   : > { %v1180_v56 = vpop.f32.mrf.mxu0 }
 0x21a   : > { %v1181_v58 = vadd.f32 %v1180_v56, %v1106_v54  ;;  %v378_v54 = vld [vmem:[#allocation8 + $0x68] sm:$0xff]  ;;  %v527_v56 = vunpack.c.l.bf16 %v382_v50  ;;  %1516 = vmatpush1.msra.mxu0 %v535_v53  ;;  %v672_v53 = vunpack.c.h.bf16 %v454_v48 }
 0x21f   : > { %v1249_v57 = vpop.f32.mrf.mxu1 }
 0x220   : > { %v1250_v59 = vadd.f32 %v1249_v57, %v1179_v55  ;;  %v528_v55 = vunpack.c.h.bf16 %v382_v50  ;;  %v374_v57 = vld [vmem:[#allocation8 + $0x48] sm:$0xff]  ;;  %v679_v50 = vunpack.c.l.bf16 %v458_v45 }
 0x221   : > { %v1251_v60 = vpop.f32.mrf.mxu1 }
 0x222   : > { %v2796_v63 = vmax.f32 %v1250_v59, 0.0  ;;  %v1252_v8 = vadd.f32 %v1251_v60, %v1181_v58  ;;  %v520_v58 = vunpack.c.h.bf16 %v378_v54  ;;  %v519_v59 = vunpack.c.l.bf16 %v378_v54  ;;  %v370_v60 = vld [vmem:[#allocation8 + $0x28] sm:$0xff]  ;;  %1517 = vmatprep.subr.mxu0 %v528_v55 }
 0x223   : > { %1518 = vmatpush1.msra.mxu0 %v527_v56  ;;  %v504_v15 = vunpack.c.h.bf16 %v370_v60  ;;  %v503_v16 = vunpack.c.l.bf16 %v370_v60  ;;  %v671_v54 = vunpack.c.l.bf16 %v454_v48  ;;  %v446_v55 = vld [vmem:[#allocation8 + $0x288] sm:$0xff]  ;;  %v664_v56 = vunpack.c.h.bf16 %v450_v7  ;;  %v425_v48 = vld [vmem:[#allocation8 + $0x1e0] sm:$0xff] }
 0x224   : > { %1304 = vrot.lane.b32.xlu0 %v2796_v63, %s2176_s16  ;;  %1312 = vrot.lane.b32.xlu1 %v2796_v63, %s2179_s18  ;;  %v2802_v9 = vmax.f32 %v1252_v8, 0.0  ;;  %v512_v8 = vunpack.c.h.bf16 %v374_v57  ;;  %v655_v60 = vunpack.c.l.bf16 %v446_v55 }
 0x225   : > { %1519 = vmatprep.subr.mxu0 %v520_v58  ;;  %v442_v58 = vld [vmem:[#allocation8 + $0x268] sm:$0xff] }
 0x226   : > { %1520 = vmatpush1.msra.mxu0 %v519_v59  ;;  %v656_v59 = vunpack.c.h.bf16 %v446_v55  ;;  %v614_v55 = vunpack.c.h.bf16 %v425_v48 }
 0x227   : > { %1521 = vmatprep.subr.mxu0 %v512_v8  ;;  %v648_v8 = vunpack.c.h.bf16 %v442_v58 }
 0x228   : > { %1296 = vrot.lane.b32.xlu0 %v2796_v63, %s2177_s17  ;;  %1314 = vrot.lane.b32.xlu1 %v2802_v9, %s2179_s18 }
 0x22c   : > { %1288 = vrot.lane.b32.xlu0 %v2796_v63, %s2178_s22  ;;  %1306 = vrot.lane.b32.xlu1 %v2802_v9, %s2176_s16  ;;  %s2093_s16 = scalar_lea.vmem %s2092_s12, 4096 }
 0x230   : > { %1280 = vrot.lane.b32.xlu0 %v2796_v63, %s2172_s9  ;;  %1298 = vrot.lane.b32.xlu1 %v2802_v9, %s2177_s17 }
 0x234   : > { %1272 = vrot.lane.b32.xlu0 %v2796_v63, %s2173_s30  ;;  %1290 = vrot.lane.b32.xlu1 %v2802_v9, %s2178_s22  ;;  %s1882_s22 = sshll.u32 %s2246_s28, 11  ;;  %s1743_s28 = scalar_lea.sflag [#allocation4], %s2360_s23 }
 0x235   : > { %s2929_s29 = scalar_lea.hbm %s2985_s7, %s1882_s22 }
 0x238   : > { %1264 = vrot.lane.b32.xlu0 %v2796_v63, %s2174_s11  ;;  %1282 = vrot.lane.b32.xlu1 %v2802_v9, %s2172_s9 }
 0x23c   : > { %1256 = vrot.lane.b32.xlu0 %v2796_v63, %s2175_s15  ;;  %1274 = vrot.lane.b32.xlu1 %v2802_v9, %s2173_s30 }
 0x240   : > { %1322 = vperm.xlu0 %1979, %v363_v10   ;;  %1266 = vrot.lane.b32.xlu1 %v2802_v9, %s2174_s11  ;;  %v511_v10 = vunpack.c.l.bf16 %v374_v57  ;;  %v663_v57 = vunpack.c.l.bf16 %v450_v7  ;;  %v421_v7 = vld [vmem:[#allocation8 + $0x1c0] sm:$0xff]  ;;  %s1872_s11 = sshll.u32 %s2360_s23, 7 }
 0x242   : > { %1522 = vmatpush1.msra.mxu0 %v511_v10  ;;  %v647_v10 = vunpack.c.l.bf16 %v442_v58  ;;  %v605_v58 = vunpack.c.l.bf16 %v421_v7 }
 0x243   : > { %1523 = vmatprep.subr.mxu0 %v504_v15 }
 0x244   : > { %1258 = vrot.lane.b32.xlu1 %v2802_v9, %s2175_s15  ;;  %1524 = vmatpush1.msra.mxu0 %v503_v16  ;;  %s2910_s15 = scalar_lea.vmem [#allocation10], %s1872_s11 }
 0x245   : > { %1525 = vmatprep.subr.mxu0 %v496_v21  ;;  %s1756_s18 = sshll.u32 %s2910_s15, 4  ;;  %s2931_s18 = int_to_ptr.vmem [resolvable:$true] %s1756_s18 }
 0x246   : > { %1526 = vmatpush1.msra.mxu0 %v495_v24  ;;  %s2087_s10 = scalar_lea.vmem %s2931_s18, 2048  ;;  %p2094_p3 = scmp.lt.s32.totalorder %s2931_s18, %s2092_s12 }
 0x247   : > { %1527 = vmatprep.subr.mxu0 %v744_v26  ;;  %p2088_p12 = scmp.ne.s32.totalorder %s2931_s18, %s2087_s10  ;;  %p2095_p2 = scmp.lt.s32.totalorder %s2093_s16, %s2087_s10 }
 0x248   : > { %1327 = vperm.xlu1 %1980, %v364_v34   ;;  %v735_v34 = vunpack.c.l.bf16 %v486_v25  ;;  %1528 = vmatpush2.msra.mxu0 %v743_v29 }
 0x249   : > { %1529 = vmatprep.subr.mxu0 %v736_v33  ;;  %p2089_p5 = pnand %p2088_p12, %p3005_p0  ;;  %p2096_p6 = por %p2095_p2, %p2094_p3 }
 0x24a   : > { %1530 = vmatpush2.msra.mxu0 %v735_v34 }
 0x24b   : > { %1531 = vmatprep.subr.mxu0 %v728_v36  ;;  %p2090_p10 = pneg %p2089_p5 }
 0x24c   : > { %1532 = vmatpush2.msra.mxu0 %v727_v12 }
 0x24d   : > { %1533 = vmatprep.subr.mxu0 %v720_v37  ;;  %p2097_p9 = pnand %p2096_p6, %p2090_p10 }
 0x24e   : > { %1534 = vmatpush2.msra.mxu0 %v719_v38 }
 0x24f   : > { %1535 = vmatprep.subr.mxu0 %v712_v2 }
 0x250   : > { %1536 = vmatpush2.msra.mxu0 %v711_v0 }
 0x251   : > { %1537 = vmatprep.subr.mxu0 %v704_v40 }
 0x252   : > { %1538 = vmatpush2.msra.mxu0 %v703_v1 }
 0x253   : > { %1539 = vmatprep.subr.mxu0 %v696_v4 }
 0x254   : > { %1540 = vmatpush2.msra.mxu0 %v695_v5 }
 0x255   : > { %1541 = vmatprep.subr.mxu0 %v688_v47 }
 0x256   : > { %1542 = vmatpush2.msra.mxu0 %v687_v6 }
 0x257   : > { %1543 = vmatprep.subr.mxu0 %v680_v49 }
 0x258   : > { %1544 = vmatpush2.msra.mxu0 %v679_v50 }
 0x259   : > { %1545 = vmatprep.subr.mxu0 %v672_v53 }
 0x25a   : > { %1546 = vmatpush2.msra.mxu0 %v671_v54 }
 0x25b   : > { %1547 = vmatprep.subr.mxu0 %v664_v56  ;;  %v417_v56 = vld [vmem:[#allocation8 + $0x1a0] sm:$0xff] }
 0x25c   : > { %1548 = vmatpush2.msra.mxu0 %v663_v57  ;;  %v606_v57 = vunpack.c.h.bf16 %v421_v7  ;;  %v598_v11 = vunpack.c.h.bf16 %v417_v56  ;;  %v469_v7 = vld [vmem:[#allocation8 + $0x340] sm:$0xff] }
 0x25d   : > { %1549 = vmatprep.subr.mxu0 %v656_v59  ;;  %v413_v59 = vld [vmem:[#allocation8 + $0x180] sm:$0xff] }
 0x25e   : > { %1550 = vmatpush2.msra.mxu0 %v655_v60  ;;  %v362_v60 = vld [vmem:[#allocation5 + $0x8] sm:$0xff] }
 0x25f   : > { %1551 = vmatprep.subr.mxu0 %v648_v8  ;;  %v590_v8 = vunpack.c.h.bf16 %v413_v59 }
 0x260   : > { %1552 = vmatpush2.msra.mxu0 %v647_v10  ;;  %v589_v10 = vunpack.c.l.bf16 %v413_v59  ;;  %v457_v59 = vld [vmem:[#allocation8 + $0x2e0] sm:$0xff] }
 0x296   : > { %v1305_v14 = vpop.permute.xlu0 %1304  ;;  %v1313_v15 = vpop.permute.xlu1 %1312 }
 0x29a   : > { %v1297_v16 = vpop.permute.xlu0 %1296  ;;  %v1315_v20 = vpop.permute.xlu1 %1314 }
 0x29b   : > { %v1316_v21 = vsel %vm1075_vm7, %v1313_v15, %v1315_v20  ;;  %v1317_v24 = vsel %vm1075_vm7, %v1315_v20, %v1313_v15  ;;  %v401_v20 = vld [vmem:[#allocation8 + $0x120] sm:$0xff] }
 0x29c   : > { %v1318_v25 = vmul.f32 %v1316_v21, %v2752_v27  ;;  %v1319_v26 = vmul.f32 %v1317_v24, %v2755_v28  ;;  %v397_v24 = vld [vmem:[#allocation8 + $0x100] sm:$0xff] }
 0x29e   : > { %v1289_v29 = vpop.permute.xlu0 %1288  ;;  %1351 = vmatprep.subr.mxu1 %v1319_v26  ;;  %v1307_v32 = vpop.permute.xlu1 %1306  ;;  %v565_v26 = vunpack.c.l.bf16 %v401_v20 }
 0x29f   : > { %v1308_v33 = vsel %vm1031_vm4, %v1305_v14, %v1307_v32  ;;  %v1309_v34 = vsel %vm1031_vm4, %v1307_v32, %v1305_v14  ;;  %1352 = vmatpush1.msra.mxu1 %v1318_v25  ;;  %v405_v14 = vld [vmem:[#allocation8 + $0x140] sm:$0xff]  ;;  %v566_v25 = vunpack.c.h.bf16 %v401_v20  ;;  %v558_v32 = vunpack.c.h.bf16 %v397_v24 }
 0x2a0   : > { %v1310_v35 = vmul.f32 %v1308_v33, %v2659_v30  ;;  %v1311_v36 = vmul.f32 %v1309_v34, %v2662_v31  ;;  %v574_v21 = vunpack.c.h.bf16 %v405_v14  ;;  %v557_v33 = vunpack.c.l.bf16 %v397_v24  ;;  %v389_v34 = vld [vmem:[#allocation8 + $0xc0] sm:$0xff] }
 0x2a2   : > { %1353 = vmatprep.subr.mxu1 %v1311_v36  ;;  %v1299_v12 = vpop.permute.xlu1 %1298  ;;  %v1281_v13 = vpop.permute.xlu0 %1280 }
 0x2a3   : > { %v1300_v27 = vsel %vm987_vm5, %v1297_v16, %v1299_v12  ;;  %v1301_v28 = vsel %vm987_vm5, %v1299_v12, %v1297_v16  ;;  %1354 = vmatpush1.msra.mxu1 %v1310_v35  ;;  %v385_v12 = vld [vmem:[#allocation8 + $0xa0] sm:$0xff] }
 0x2a4   : > { %v1302_v37 = vmul.f32 %v1300_v27, %v2690_v61  ;;  %v1303_v38 = vmul.f32 %v1301_v28, %v2693_v62  ;;  %v542_v27 = vunpack.c.h.bf16 %v389_v34  ;;  %v541_v28 = vunpack.c.l.bf16 %v389_v34 }
 0x2a6   : > { %1355 = vmatprep.subr.mxu1 %v1303_v38  ;;  %v1291_v39 = vpop.permute.xlu1 %1290  ;;  %v1273_v3 = vpop.permute.xlu0 %1272  ;;  %v533_v38 = vunpack.c.l.bf16 %v385_v12 }
 0x2a7   : > { %v1292_v30 = vsel %vm943_vm6, %v1289_v29, %v1291_v39  ;;  %v1293_v31 = vsel %vm943_vm6, %v1291_v39, %v1289_v29  ;;  %1356 = vmatpush1.msra.mxu1 %v1302_v37  ;;  %v393_v29 = vld [vmem:[#allocation8 + $0xe0] sm:$0xff]  ;;  %v534_v37 = vunpack.c.h.bf16 %v385_v12 }
 0x2a8   : > { %v1294_v2 = vmul.f32 %v1292_v30, %v2721_v42  ;;  %v1295_v0 = vmul.f32 %v1293_v31, %v2724_v44  ;;  %v550_v35 = vunpack.c.h.bf16 %v393_v29  ;;  %v549_v36 = vunpack.c.l.bf16 %v393_v29  ;;  %v377_v39 = vld [vmem:[#allocation8 + $0x60] sm:$0xff] }
 0x2aa   : > { %1357 = vmatprep.subr.mxu1 %v1295_v0  ;;  %v1283_v40 = vpop.permute.xlu1 %1282  ;;  %v1265_v5 = vpop.permute.xlu0 %1264  ;;  %v518_v0 = vunpack.c.h.bf16 %v377_v39 }
 0x2ab   : > { %v1284_v61 = vsel %vm899_vm0, %v1281_v13, %v1283_v40  ;;  %v1285_v62 = vsel %vm899_vm0, %v1283_v40, %v1281_v13  ;;  %1358 = vmatpush1.msra.mxu1 %v1294_v2  ;;  %v381_v13 = vld [vmem:[#allocation8 + $0x80] sm:$0xff] }
 0x2ac   : > { %v1286_v1 = vmul.f32 %v1285_v62, %v2526_v18  ;;  %v1287_v41 = vmul.f32 %v1284_v61, %v2523_v17  ;;  %1359 = vmatprep.subr.mxu1 %v2802_v9  ;;  %v526_v30 = vunpack.c.h.bf16 %v381_v13  ;;  %v525_v31 = vunpack.c.l.bf16 %v381_v13  ;;  %v373_v2 = vld [vmem:[#allocation8 + $0x40] sm:$0xff] }
 0x2ad   : > { %1360 = vmatpush1.msra.mxu1 %v2796_v63  ;;  %v369_v40 = vld [vmem:[#allocation8 + $0x20] sm:$0xff]  ;;  %v510_v61 = vunpack.c.h.bf16 %v373_v2  ;;  %v509_v62 = vunpack.c.l.bf16 %v373_v2 }
 0x2ae   : > { %1361 = vmatprep.subr.mxu1 %v1287_v41  ;;  %v1275_v42 = vpop.permute.xlu1 %1274  ;;  %v1257_v49 = vpop.permute.xlu0 %1256  ;;  %v502_v41 = vunpack.c.h.bf16 %v369_v40 }
 0x2af   : > { %v1276_v44 = vsel %vm855_vm1, %v1273_v3, %v1275_v42  ;;  %v1277_v4 = vsel %vm855_vm1, %v1275_v42, %v1273_v3  ;;  %1362 = vmatpush1.msra.mxu1 %v1286_v1  ;;  %v517_v3 = vunpack.c.l.bf16 %v377_v39  ;;  %v365_v1 = vld [vmem:[#allocation8] sm:$0xff]  ;;  %v501_v42 = vunpack.c.l.bf16 %v369_v40 }
 0x2b0   : > { %v1278_v45 = vmul.f32 %v1277_v4, %v2563_v43  ;;  %v1279_v18 = vmul.f32 %v1276_v44, %v2569_v46  ;;  %v489_v44 = vld [vmem:[#allocation8 + $0x3e0] sm:$0xff]  ;;  %v494_v4 = vunpack.c.h.bf16 %v365_v1 }
 0x2b2   : > { %1363 = vmatprep.subr.mxu1 %v1279_v18  ;;  %v1267_v17 = vpop.permute.xlu1 %1266  ;;  %v742_v18 = vunpack.c.h.bf16 %v489_v44 }
 0x2b3   : > { %v1268_v9 = vsel %vm811_vm2, %v1265_v5, %v1267_v17  ;;  %v1269_v63 = vsel %vm811_vm2, %v1267_v17, %v1265_v5  ;;  %1364 = vmatpush1.msra.mxu1 %v1278_v45  ;;  %v493_v5 = vunpack.c.l.bf16 %v365_v1  ;;  %v485_v45 = vld [vmem:[#allocation8 + $0x3c0] sm:$0xff]  ;;  %v741_v17 = vunpack.c.l.bf16 %v489_v44 }
 0x2b4   : > { %v1270_v47 = vmul.f32 %v1269_v63, %v2597_v22  ;;  %v1271_v6 = vmul.f32 %v1268_v9, %v2600_v23  ;;  %v361_v22 = vld [vmem:[#allocation5] sm:$0xff]  ;;  %v613_v23 = vunpack.c.l.bf16 %v425_v48  ;;  %v734_v63 = vunpack.c.h.bf16 %v485_v45 }
 0x2b5   : > { %v481_v9 = vld [vmem:[#allocation8 + $0x3a0] sm:$0xff] }
 0x2b6   : > { %1365 = vmatprep.subr.mxu1 %v1271_v6  ;;  %v1259_v50 = vpop.permute.xlu1 %1258  ;;  %v477_v6 = vld [vmem:[#allocation8 + $0x380] sm:$0xff]  ;;  %v726_v48 = vunpack.c.h.bf16 %v481_v9 }
 0x2b7   : > { %v1260_v43 = vsel %vm767_vm3, %v1257_v49, %v1259_v50  ;;  %v1261_v46 = vsel %vm767_vm3, %v1259_v50, %v1257_v49  ;;  %1366 = vmatpush1.msra.mxu1 %v1270_v47  ;;  %v733_v47 = vunpack.c.l.bf16 %v485_v45  ;;  %v725_v49 = vunpack.c.l.bf16 %v481_v9  ;;  %v473_v50 = vld [vmem:[#allocation8 + $0x360] sm:$0xff]  ;;  %v424_v9 = vld [vmem:[#allocation8 + $0x1d8] sm:$0xff] }
 0x2b8   : > { %v1262_v53 = vmul.f32 %v1261_v46, %v2628_v51  ;;  %v1263_v54 = vmul.f32 %v1260_v43, %v2631_v52  ;;  %v597_v51 = vunpack.c.l.bf16 %v417_v56  ;;  %v409_v52 = vld [vmem:[#allocation8 + $0x160] sm:$0xff]  ;;  %v718_v43 = vunpack.c.h.bf16 %v477_v6 }
 0x2b9   : > { %v582_v15 = vunpack.c.h.bf16 %v409_v52  ;;  %v581_v16 = vunpack.c.l.bf16 %v409_v52  ;;  %v717_v46 = vunpack.c.l.bf16 %v477_v6  ;;  %v461_v56 = vld [vmem:[#allocation8 + $0x300] sm:$0xff]  ;;  %v678_v52 = vunpack.c.h.bf16 %v457_v59 }
 0x2ba   : > { %1367 = vmatprep.subr.mxu1 %v1263_v54  ;;  %v709_v54 = vunpack.c.l.bf16 %v473_v50 }
 0x2bb   : > { %1368 = vmatpush1.msra.mxu1 %v1262_v53  ;;  %v710_v53 = vunpack.c.h.bf16 %v473_v50  ;;  %v1323_v44 = vpop.permute.xlu0 %1322 }
 0x2bc   : > { %1874 = vmatmul.mubr.msk.f32.vlgmr.msra.gmra.mxu1 %vm1330_vm9, %v361_v22  ;;  %1418 = vmatprep.subr.mxu1 %v614_v55  ;;  %v465_v55 = vld [vmem:[#allocation8 + $0x320] sm:$0xff]  ;;  %v702_v22 = vunpack.c.h.bf16 %v469_v7 }
 0x2bd   : > { %1407 = vmatprep.mubr.f32.mxu1 %v2180_v19  ;;  %1419 = vmatpush1.msra.mxu1 %v613_v23  ;;  %v573_v19 = vunpack.c.l.bf16 %v405_v14  ;;  %v701_v23 = vunpack.c.l.bf16 %v469_v7  ;;  %v612_v7 = vunpack.c.h.bf16 %v424_v9 }
 0x2be   : > { %1420 = vmatprep.subr.mxu1 %v606_v57  ;;  %v694_v57 = vunpack.c.h.bf16 %v465_v55 }
 0x2bf   : > { %1421 = vmatpush1.msra.mxu1 %v605_v58  ;;  %v693_v58 = vunpack.c.l.bf16 %v465_v55 }
 0x2c0   : > { %1875 = vmatmul.mubr.msk.f32.gmra.mxu1 %vm1330_vm9, %v362_v60  ;;  %1422 = vmatprep.subr.mxu1 %v598_v11  ;;  %v686_v11 = vunpack.c.h.bf16 %v461_v56  ;;  %v685_v60 = vunpack.c.l.bf16 %v461_v56 }
 0x2c1   : > { %1423 = vmatpush1.msra.mxu1 %v597_v51  ;;  %v453_v51 = vld [vmem:[#allocation8 + $0x2c0] sm:$0xff] }
 0x2c2   : > { %1424 = vmatprep.subr.mxu1 %v590_v8  ;;  %v677_v8 = vunpack.c.l.bf16 %v457_v59  ;;  %v670_v14 = vunpack.c.h.bf16 %v453_v51  ;;  %v415_v59 = vld [vmem:[#allocation8 + $0x190] sm:$0xff] }
 0x2c3   : > { %1425 = vmatpush1.msra.mxu1 %v589_v10  ;;  %v449_v10 = vld [vmem:[#allocation8 + $0x2a0] sm:$0xff] }
 0x2c4   : > { %1426 = vmatprep.subr.mxu1 %v582_v15  ;;  %v669_v15 = vunpack.c.l.bf16 %v453_v51  ;;  %v662_v20 = vunpack.c.h.bf16 %v449_v10 }
 0x2c5   : > { %1427 = vmatpush1.msra.mxu1 %v581_v16  ;;  %v445_v16 = vld [vmem:[#allocation8 + $0x280] sm:$0xff] }
 0x2c6   : > { %1428 = vmatprep.subr.mxu1 %v574_v21  ;;  %v661_v21 = vunpack.c.l.bf16 %v449_v10  ;;  %v654_v24 = vunpack.c.h.bf16 %v445_v16  ;;  %v411_v10 = vld [vmem:[#allocation8 + $0x170] sm:$0xff] }
 0x2c7   : > { %1429 = vmatpush1.msra.mxu1 %v573_v19  ;;  %v441_v19 = vld [vmem:[#allocation8 + $0x260] sm:$0xff] }
 0x2c8   : > { %1430 = vmatprep.subr.mxu1 %v566_v25  ;;  %v653_v25 = vunpack.c.l.bf16 %v445_v16  ;;  %v645_v29 = vunpack.c.l.bf16 %v441_v19  ;;  %v593_v16 = vunpack.c.l.bf16 %v415_v59 }
 0x2c9   : > { %1431 = vmatpush1.msra.mxu1 %v565_v26  ;;  %v646_v26 = vunpack.c.h.bf16 %v441_v19  ;;  %v408_v19 = vld [vmem:[#allocation8 + $0x158] sm:$0xff] }
 0x2ca   : > { %1432 = vmatprep.subr.mxu1 %v558_v32  ;;  %v437_v32 = vld [vmem:[#allocation8 + $0x240] sm:$0xff] }
 0x2cb   : > { %1433 = vmatpush1.msra.mxu1 %v557_v33  ;;  %v438_v33 = vld [vmem:[#allocation8 + $0x248] sm:$0xff]  ;;  %v638_v34 = vunpack.c.h.bf16 %v437_v32 }
 0x2cc   : > { %1434 = vmatprep.subr.mxu1 %v550_v35  ;;  %v640_v35 = vunpack.c.h.bf16 %v438_v33  ;;  %v639_v12 = vunpack.c.l.bf16 %v438_v33  ;;  %v404_v33 = vld [vmem:[#allocation8 + $0x138] sm:$0xff] }
 0x2cd   : > { %1435 = vmatpush1.msra.mxu1 %v549_v36  ;;  %v637_v36 = vunpack.c.l.bf16 %v437_v32  ;;  %v403_v32 = vld [vmem:[#allocation8 + $0x130] sm:$0xff] }
 0x2ce   : > { %1436 = vmatprep.subr.mxu1 %v542_v27  ;;  %v433_v27 = vld [vmem:[#allocation8 + $0x220] sm:$0xff]  ;;  %1553 = vmatprep.subr.mxu0 %v640_v35  ;;  %v580_v35 = vunpack.c.h.bf16 %v408_v19 }
 0x2cf   : > { %1437 = vmatpush1.msra.mxu1 %v541_v28  ;;  %v434_v28 = vld [vmem:[#allocation8 + $0x228] sm:$0xff]  ;;  %v630_v13 = vunpack.c.h.bf16 %v433_v27  ;;  %1554 = vmatpush2.msra.mxu0 %v639_v12  ;;  %v579_v12 = vunpack.c.l.bf16 %v408_v19 }
 0x2d0   : > { %1438 = vmatprep.subr.mxu1 %v534_v37  ;;  %v632_v37 = vunpack.c.h.bf16 %v434_v28  ;;  %v631_v39 = vunpack.c.l.bf16 %v434_v28  ;;  %v400_v28 = vld [vmem:[#allocation8 + $0x118] sm:$0xff] }
 0x2d1   : > { %1439 = vmatpush1.msra.mxu1 %v533_v38  ;;  %v629_v38 = vunpack.c.l.bf16 %v433_v27  ;;  %v399_v27 = vld [vmem:[#allocation8 + $0x110] sm:$0xff] }
 0x2d2   : > { %1440 = vmatprep.subr.mxu1 %v526_v30  ;;  %v429_v30 = vld [vmem:[#allocation8 + $0x200] sm:$0xff]  ;;  %1555 = vmatprep.subr.mxu0 %v632_v37  ;;  %v572_v37 = vunpack.c.h.bf16 %v404_v33 }
 0x2d3   : > { %1441 = vmatpush1.msra.mxu1 %v525_v31  ;;  %v430_v31 = vld [vmem:[#allocation8 + $0x208] sm:$0xff]  ;;  %v622_v2 = vunpack.c.h.bf16 %v429_v30  ;;  %1556 = vmatpush2.msra.mxu0 %v631_v39  ;;  %v571_v39 = vunpack.c.l.bf16 %v404_v33 }
 0x2d4   : > { %1442 = vmatprep.subr.mxu1 %v518_v0  ;;  %v624_v0 = vunpack.c.h.bf16 %v430_v31  ;;  %v623_v40 = vunpack.c.l.bf16 %v430_v31  ;;  %v396_v31 = vld [vmem:[#allocation8 + $0xf8] sm:$0xff] }
 0x2d5   : > { %1443 = vmatpush1.msra.mxu1 %v517_v3  ;;  %v621_v3 = vunpack.c.l.bf16 %v429_v30  ;;  %v395_v30 = vld [vmem:[#allocation8 + $0xf0] sm:$0xff] }
 0x2d6   : > { %1444 = vmatprep.subr.mxu1 %v510_v61  ;;  %v427_v61 = vld [vmem:[#allocation8 + $0x1f0] sm:$0xff]  ;;  %1557 = vmatprep.subr.mxu0 %v624_v0  ;;  %v564_v0 = vunpack.c.h.bf16 %v400_v28 }
 0x2d7   : > { %1445 = vmatpush1.msra.mxu1 %v509_v62  ;;  %v428_v62 = vld [vmem:[#allocation8 + $0x1f8] sm:$0xff]  ;;  %v618_v1 = vunpack.c.h.bf16 %v427_v61  ;;  %1558 = vmatpush2.msra.mxu0 %v623_v40  ;;  %v617_v6 = vunpack.c.l.bf16 %v427_v61  ;;  %v563_v40 = vunpack.c.l.bf16 %v400_v28  ;;  %v391_v61 = vld [vmem:[#allocation8 + $0xd0] sm:$0xff] }
 0x2d8   : > { %1446 = vmatprep.subr.mxu1 %v502_v41  ;;  %v620_v41 = vunpack.c.h.bf16 %v428_v62 }
 0x2d9   : > { %1447 = vmatpush1.msra.mxu1 %v501_v42 }
 0x2da   : > { %1448 = vmatprep.subr.mxu1 %v494_v4  ;;  %1649 = vmatprep.subr.mxu0 %v620_v41  ;;  %v556_v41 = vunpack.c.h.bf16 %v396_v31 }
 0x2db   : > { %1449 = vmatpush1.msra.mxu1 %v493_v5 }
 0x2dc   : > { %1450 = vmatprep.subr.mxu1 %v742_v18  ;;  %v1328_v18 = vpop.permute.xlu1 %1327 }
 0x2dd   : > { %1451 = vmatpush2.msra.mxu1 %v741_v17  ;;  %v423_v17 = vld [vmem:[#allocation8 + $0x1d0] sm:$0xff] }
 0x2de   : > { %1452 = vmatprep.subr.mxu1 %v734_v63 }
 0x2df   : > { %1453 = vmatpush2.msra.mxu1 %v733_v47 }
 0x2e0   : > { %1454 = vmatprep.subr.mxu1 %v726_v48  ;;  %v619_v48 = vunpack.c.l.bf16 %v428_v62  ;;  %v392_v62 = vld [vmem:[#allocation8 + $0xd8] sm:$0xff] }
 0x2e1   : > { %1455 = vmatpush2.msra.mxu1 %v725_v49 }
 0x2e2   : > { %1456 = vmatprep.subr.mxu1 %v718_v43 }
 0x2e3   : > { %1457 = vmatpush2.msra.mxu1 %v717_v46  ;;  %v610_v46 = vunpack.c.h.bf16 %v423_v17 }
 0x2e4   : > { %1458 = vmatprep.subr.mxu1 %v710_v53  ;;  %v419_v53 = vld [vmem:[#allocation8 + $0x1b0] sm:$0xff] }
 0x2e5   : > { %1459 = vmatpush2.msra.mxu1 %v709_v54  ;;  %v420_v54 = vld [vmem:[#allocation8 + $0x1b8] sm:$0xff]  ;;  %v601_v51 = vunpack.c.l.bf16 %v419_v53 }
 0x2e6   : > { %1460 = vmatprep.subr.mxu1 %v702_v22  ;;  %v609_v22 = vunpack.c.l.bf16 %v423_v17  ;;  %v545_v17 = vunpack.c.l.bf16 %v391_v61 }
 0x2e7   : > { %1461 = vmatpush2.msra.mxu1 %v701_v23  ;;  %v611_v23 = vunpack.c.l.bf16 %v424_v9  ;;  %v547_v9 = vunpack.c.l.bf16 %v392_v62 }
 0x2e8   : > { %1462 = vmatprep.subr.mxu1 %v694_v57  ;;  %v602_v57 = vunpack.c.h.bf16 %v419_v53 }
 0x2e9   : > { %1463 = vmatpush2.msra.mxu1 %v693_v58  ;;  %v604_v58 = vunpack.c.h.bf16 %v420_v54 }
 0x2ea   : > { %1464 = vmatprep.subr.mxu1 %v686_v11 }
 0x2eb   : > { %1465 = vmatpush2.msra.mxu1 %v685_v60  ;;  %v416_v60 = vld [vmem:[#allocation8 + $0x198] sm:$0xff] }
 0x2ec   : > { %1466 = vmatprep.subr.mxu1 %v678_v52  ;;  %v603_v52 = vunpack.c.l.bf16 %v420_v54 }
 0x2ed   : > { %1467 = vmatpush2.msra.mxu1 %v677_v8  ;;  %v594_v8 = vunpack.c.h.bf16 %v415_v59 }
 0x2ee   : > { %1468 = vmatprep.subr.mxu1 %v670_v14  ;;  %v412_v14 = vld [vmem:[#allocation8 + $0x178] sm:$0xff] }
 0x2ef   : > { %1469 = vmatpush2.msra.mxu1 %v669_v15  ;;  %v596_v15 = vunpack.c.h.bf16 %v416_v60 }
 0x2f0   : > { %1470 = vmatprep.subr.mxu1 %v662_v20  ;;  %v595_v20 = vunpack.c.l.bf16 %v416_v60 }
 0x2f1   : > { %1471 = vmatpush2.msra.mxu1 %v661_v21  ;;  %v407_v21 = vld [vmem:[#allocation8 + $0x150] sm:$0xff] }
 0x2f2   : > { %1472 = vmatprep.subr.mxu1 %v654_v24  ;;  %v586_v24 = vunpack.c.h.bf16 %v411_v10 }
 0x2f3   : > { %1473 = vmatpush2.msra.mxu1 %v653_v25  ;;  %v588_v25 = vunpack.c.h.bf16 %v412_v14 }
 0x2f4   : > { %1474 = vmatprep.subr.mxu1 %v646_v26  ;;  %v585_v26 = vunpack.c.l.bf16 %v411_v10 }
 0x2f5   : > { %1475 = vmatpush2.msra.mxu1 %v645_v29  ;;  %v587_v29 = vunpack.c.l.bf16 %v412_v14 }
 0x2f6   : > { %1476 = vmatprep.subr.mxu1 %v638_v34  ;;  %v578_v34 = vunpack.c.h.bf16 %v407_v21 }
 0x2f7   : > { %1477 = vmatpush2.msra.mxu1 %v637_v36  ;;  %v577_v36 = vunpack.c.l.bf16 %v407_v21  ;;  %v368_v21 = vld [vmem:[#allocation8 + $0x18] sm:$0xff] }
 0x2f8   : > { %1478 = vmatprep.subr.mxu1 %v630_v13  ;;  %v570_v13 = vunpack.c.h.bf16 %v403_v32 }
 0x2f9   : > { %1479 = vmatpush2.msra.mxu1 %v629_v38  ;;  %v569_v38 = vunpack.c.l.bf16 %v403_v32  ;;  %v492_v32 = vld [vmem:[#allocation8 + $0x3f8] sm:$0xff] }
 0x2fa   : > { %1480 = vmatprep.subr.mxu1 %v622_v2  ;;  %v562_v2 = vunpack.c.h.bf16 %v399_v27 }
 0x2fb   : > { %1481 = vmatpush2.msra.mxu1 %v621_v3  ;;  %v561_v3 = vunpack.c.l.bf16 %v399_v27  ;;  %v488_v27 = vld [vmem:[#allocation8 + $0x3d8] sm:$0xff] }
 0x2fc   : > { %1572 = vmatprep.subr.mxu1 %v618_v1  ;;  %v554_v1 = vunpack.c.h.bf16 %v395_v30 }
 0x37c   : > { %v1403_v42 = vpop.f32.mrf.mxu1 }
 0x37d   : > { %v1404_v4 = vadd.f32 %v1403_v42, %v1323_v44  ;;  %v553_v42 = vunpack.c.l.bf16 %v395_v30  ;;  %v484_v30 = vld [vmem:[#allocation8 + $0x3b8] sm:$0xff] }
 0x37e   : > { %v1405_v5 = vpop.f32.mrf.mxu1 }
 0x37f   : > { %v1406_v45 = vadd.f32 %v1405_v5, %v1323_v44  ;;  %v2891_v49 = vmax.f32 %v1404_v4, 0.0  ;;  %v555_v44 = vunpack.c.l.bf16 %v396_v31  ;;  %v387_v4 = vld [vmem:[#allocation8 + $0xb0] sm:$0xff]  ;;  %v388_v5 = vld [vmem:[#allocation8 + $0xb8] sm:$0xff] }
 0x380   : > { %v1409_v63 = vpop.f32.mrf.mxu1 }
 0x381   : > { %v1415_v47 = vmax.f32 %v1406_v45, 0.0  ;;  %v1410_v43 = vadd.f32 %v1409_v63, %v1328_v18  ;;  %v546_v45 = vunpack.c.h.bf16 %v391_v61  ;;  %v383_v63 = vld [vmem:[#allocation8 + $0x90] sm:$0xff]  ;;  %v480_v61 = vld [vmem:[#allocation8 + $0x398] sm:$0xff] }
 0x382   : > { %v1411_v50 = vpop.f32.mrf.mxu1  ;;  %v530_v53 = vunpack.c.h.bf16 %v383_v63 }
 0x383   : > { %v1412_v55 = vadd.f32 %v1411_v50, %v1328_v18  ;;  %1482 = vmatprep.mubr.f32.mxu1 %v1415_v47  ;;  %1559 = vmatprep.mubr.f32.mxu0 %v1415_v47  ;;  %v2897_v11 = vmax.f32 %v1410_v43, 0.0  ;;  %v548_v18 = vunpack.c.h.bf16 %v392_v62  ;;  %v537_v50 = vunpack.c.l.bf16 %v387_v4 }
 0x384   : > { %1483 = vmatmul.mubr.f32.vlgmr.msra.gmra.mxu1 %v2891_v49  ;;  %1560 = vmatmul.mubr.f32.vlgmr.msra.gmra.mxu0 %v2891_v49  ;;  %v539_v43 = vunpack.c.l.bf16 %v388_v5 }
 0x385   : > { %v2895_v56 = vmax.f32 %v1412_v55, 0.0  ;;  %1573 = vmatpush1.msra.mxu1 %v617_v6  ;;  %1650 = vmatpush1.msra.mxu0 %v619_v48  ;;  %v538_v6 = vunpack.c.h.bf16 %v387_v4  ;;  %v540_v48 = vunpack.c.h.bf16 %v388_v5  ;;  %v529_v55 = vunpack.c.l.bf16 %v383_v63  ;;  %v476_v4 = vld [vmem:[#allocation8 + $0x378] sm:$0xff] }
 0x386   : > { %1574 = vmatprep.subr.mxu1 %v610_v46  ;;  %1651 = vmatprep.subr.mxu0 %v612_v7  ;;  %v379_v46 = vld [vmem:[#allocation8 + $0x70] sm:$0xff]  ;;  %v380_v7 = vld [vmem:[#allocation8 + $0x78] sm:$0xff] }
 0x387   : > { %1575 = vmatpush1.msra.mxu1 %v609_v22  ;;  %1652 = vmatpush1.msra.mxu0 %v611_v23  ;;  %v375_v23 = vld [vmem:[#allocation8 + $0x50] sm:$0xff]  ;;  %v524_v59 = vunpack.c.h.bf16 %v380_v7  ;;  %v521_v60 = vunpack.c.l.bf16 %v379_v46  ;;  %v472_v63 = vld [vmem:[#allocation8 + $0x358] sm:$0xff] }
 0x388   : > { %1488 = vmatprep.mubr.f32.mxu1 %v2895_v56  ;;  %1565 = vmatprep.mubr.f32.mxu0 %v2895_v56  ;;  %v514_v10 = vunpack.c.h.bf16 %v375_v23 }
 0x389   : > { %1576 = vmatprep.subr.mxu1 %v602_v57  ;;  %1653 = vmatprep.subr.mxu0 %v604_v58  ;;  %v376_v57 = vld [vmem:[#allocation8 + $0x58] sm:$0xff]  ;;  %v522_v58 = vunpack.c.h.bf16 %v379_v46 }
 0x38a   : > { %1489 = vmatmul.mubr.f32.gmra.mxu1 %v2897_v11  ;;  %1566 = vmatmul.mubr.f32.gmra.mxu0 %v2897_v11  ;;  %v516_v14 = vunpack.c.h.bf16 %v376_v57  ;;  %v468_v46 = vld [vmem:[#allocation8 + $0x338] sm:$0xff] }
 0x38b   : > { %1577 = vmatpush1.msra.mxu1 %v601_v51  ;;  %1654 = vmatpush1.msra.mxu0 %v603_v52  ;;  %v523_v51 = vunpack.c.l.bf16 %v380_v7  ;;  %v371_v52 = vld [vmem:[#allocation8 + $0x30] sm:$0xff] }
 0x38c   : > { %1578 = vmatprep.subr.mxu1 %v594_v8  ;;  %1636 = vmatprep.mubr.f32.mxu1 %v1415_v47  ;;  %v372_v8 = vld [vmem:[#allocation8 + $0x38] sm:$0xff]  ;;  %v506_v19 = vunpack.c.h.bf16 %v371_v52 }
 0x38d   : > { %1655 = vmatprep.subr.mxu0 %v596_v15  ;;  %1713 = vmatprep.mubr.f32.mxu0 %v1415_v47  ;;  %v384_v47 = vld [vmem:[#allocation8 + $0x98] sm:$0xff]  ;;  %v513_v15 = vunpack.c.l.bf16 %v375_v23 }
 0x38e   : > { %1579 = vmatpush1.msra.mxu1 %v593_v16  ;;  %1656 = vmatpush1.msra.mxu0 %v595_v20  ;;  %v532_v54 = vunpack.c.h.bf16 %v384_v47  ;;  %v531_v22 = vunpack.c.l.bf16 %v384_v47  ;;  %v515_v16 = vunpack.c.l.bf16 %v376_v57  ;;  %v367_v20 = vld [vmem:[#allocation8 + $0x10] sm:$0xff]  ;;  %v464_v23 = vld [vmem:[#allocation8 + $0x318] sm:$0xff] }
 0x38f   : > { %1580 = vmatprep.subr.mxu1 %v586_v24  ;;  %1657 = vmatprep.subr.mxu0 %v588_v25  ;;  %v508_v24 = vunpack.c.h.bf16 %v372_v8  ;;  %v505_v25 = vunpack.c.l.bf16 %v371_v52  ;;  %v498_v33 = vunpack.c.h.bf16 %v367_v20  ;;  %v460_v52 = vld [vmem:[#allocation8 + $0x2f8] sm:$0xff] }
 0x390   : > { %1581 = vmatpush1.msra.mxu1 %v585_v26  ;;  %1658 = vmatpush1.msra.mxu0 %v587_v29  ;;  %v507_v26 = vunpack.c.l.bf16 %v372_v8  ;;  %v491_v29 = vld [vmem:[#allocation8 + $0x3f0] sm:$0xff] }
 0x391   : > { %1582 = vmatprep.subr.mxu1 %v578_v34  ;;  %1659 = vmatprep.subr.mxu0 %v580_v35  ;;  %v500_v34 = vunpack.c.h.bf16 %v368_v21  ;;  %v497_v35 = vunpack.c.l.bf16 %v367_v20  ;;  %v746_v28 = vunpack.c.h.bf16 %v491_v29  ;;  %v456_v20 = vld [vmem:[#allocation8 + $0x2d8] sm:$0xff] }
 0x392   : > { %1583 = vmatpush1.msra.mxu1 %v577_v36  ;;  %1660 = vmatpush1.msra.mxu0 %v579_v12  ;;  %v499_v36 = vunpack.c.l.bf16 %v368_v21  ;;  %v487_v12 = vld [vmem:[#allocation8 + $0x3d0] sm:$0xff] }
 0x393   : > { %1584 = vmatprep.subr.mxu1 %v570_v13  ;;  %1661 = vmatprep.subr.mxu0 %v572_v37  ;;  %v748_v13 = vunpack.c.h.bf16 %v492_v32  ;;  %v745_v37 = vunpack.c.l.bf16 %v491_v29  ;;  %v738_v31 = vunpack.c.h.bf16 %v487_v12  ;;  %v452_v29 = vld [vmem:[#allocation8 + $0x2b8] sm:$0xff] }
 0x394   : > { %1585 = vmatpush1.msra.mxu1 %v569_v38  ;;  %1662 = vmatpush1.msra.mxu0 %v571_v39  ;;  %v747_v38 = vunpack.c.l.bf16 %v492_v32  ;;  %v483_v39 = vld [vmem:[#allocation8 + $0x3b0] sm:$0xff] }
 0x395   : > { %1586 = vmatprep.subr.mxu1 %v562_v2  ;;  %1663 = vmatprep.subr.mxu0 %v564_v0  ;;  %v740_v2 = vunpack.c.h.bf16 %v488_v27  ;;  %v737_v0 = vunpack.c.l.bf16 %v487_v12  ;;  %v730_v62 = vunpack.c.h.bf16 %v483_v39  ;;  %v448_v12 = vld [vmem:[#allocation8 + $0x298] sm:$0xff] }
 0x396   : > { %1587 = vmatpush1.msra.mxu1 %v561_v3  ;;  %1664 = vmatpush1.msra.mxu0 %v563_v40  ;;  %v739_v3 = vunpack.c.l.bf16 %v488_v27  ;;  %v479_v40 = vld [vmem:[#allocation8 + $0x390] sm:$0xff] }
 0x397   : > { %1588 = vmatprep.subr.mxu1 %v554_v1  ;;  %1665 = vmatprep.subr.mxu0 %v556_v41  ;;  %v732_v1 = vunpack.c.h.bf16 %v484_v30  ;;  %v729_v41 = vunpack.c.l.bf16 %v483_v39  ;;  %v722_v5 = vunpack.c.h.bf16 %v479_v40  ;;  %v444_v39 = vld [vmem:[#allocation8 + $0x278] sm:$0xff] }
 0x398   : > { %1589 = vmatpush1.msra.mxu1 %v553_v42  ;;  %1666 = vmatpush1.msra.mxu0 %v555_v44  ;;  %v731_v42 = vunpack.c.l.bf16 %v484_v30  ;;  %v475_v44 = vld [vmem:[#allocation8 + $0x370] sm:$0xff] }
 0x399   : > { %1590 = vmatprep.subr.mxu1 %v546_v45  ;;  %1667 = vmatprep.subr.mxu0 %v548_v18  ;;  %v724_v45 = vunpack.c.h.bf16 %v480_v61  ;;  %v721_v18 = vunpack.c.l.bf16 %v479_v40  ;;  %v714_v47 = vunpack.c.h.bf16 %v475_v44  ;;  %v440_v40 = vld [vmem:[#allocation8 + $0x258] sm:$0xff] }
 0x39a   : > { %1591 = vmatpush1.msra.mxu1 %v545_v17  ;;  %1668 = vmatpush1.msra.mxu0 %v547_v9  ;;  %v723_v17 = vunpack.c.l.bf16 %v480_v61  ;;  %v471_v9 = vld [vmem:[#allocation8 + $0x350] sm:$0xff] }
 0x39b   : > { %1592 = vmatprep.subr.mxu1 %v538_v6  ;;  %1669 = vmatprep.subr.mxu0 %v540_v48  ;;  %v716_v6 = vunpack.c.h.bf16 %v476_v4  ;;  %v713_v48 = vunpack.c.l.bf16 %v475_v44  ;;  %v706_v7 = vunpack.c.h.bf16 %v471_v9  ;;  %v436_v44 = vld [vmem:[#allocation8 + $0x238] sm:$0xff] }
 0x39c   : > { %1593 = vmatpush1.msra.mxu1 %v537_v50  ;;  %1670 = vmatpush1.msra.mxu0 %v539_v43  ;;  %v715_v50 = vunpack.c.l.bf16 %v476_v4  ;;  %v467_v43 = vld [vmem:[#allocation8 + $0x330] sm:$0xff] }
 0x39d   : > { %1594 = vmatprep.subr.mxu1 %v530_v53  ;;  %1671 = vmatprep.subr.mxu0 %v532_v54  ;;  %v708_v53 = vunpack.c.h.bf16 %v472_v63  ;;  %v705_v54 = vunpack.c.l.bf16 %v471_v9  ;;  %v698_v57 = vunpack.c.h.bf16 %v467_v43  ;;  %v432_v9 = vld [vmem:[#allocation8 + $0x218] sm:$0xff] }
 0x39e   : > { %1595 = vmatpush1.msra.mxu1 %v529_v55  ;;  %1672 = vmatpush1.msra.mxu0 %v531_v22  ;;  %v707_v55 = vunpack.c.l.bf16 %v472_v63  ;;  %v463_v22 = vld [vmem:[#allocation8 + $0x310] sm:$0xff] }
 0x39f   : > { %1596 = vmatprep.subr.mxu1 %v522_v58  ;;  %1673 = vmatprep.subr.mxu0 %v524_v59  ;;  %v700_v58 = vunpack.c.h.bf16 %v468_v46  ;;  %v697_v59 = vunpack.c.l.bf16 %v467_v43  ;;  %v690_v8 = vunpack.c.h.bf16 %v463_v22  ;;  %v628_v43 = vunpack.c.h.bf16 %v432_v9 }
 0x3a0   : > { %1597 = vmatpush1.msra.mxu1 %v521_v60  ;;  %1674 = vmatpush1.msra.mxu0 %v523_v51  ;;  %v699_v60 = vunpack.c.l.bf16 %v468_v46  ;;  %v459_v51 = vld [vmem:[#allocation8 + $0x2f0] sm:$0xff] }
 0x3a1   : > { %1598 = vmatprep.subr.mxu1 %v514_v10  ;;  %1675 = vmatprep.subr.mxu0 %v516_v14  ;;  %v692_v10 = vunpack.c.h.bf16 %v464_v23  ;;  %v689_v14 = vunpack.c.l.bf16 %v463_v22  ;;  %v682_v21 = vunpack.c.h.bf16 %v459_v51 }
 0x3a2   : > { %1599 = vmatpush1.msra.mxu1 %v513_v15  ;;  %1676 = vmatpush1.msra.mxu0 %v515_v16  ;;  %v691_v15 = vunpack.c.l.bf16 %v464_v23  ;;  %v455_v16 = vld [vmem:[#allocation8 + $0x2d0] sm:$0xff] }
 0x3a3   : > { %1600 = vmatprep.subr.mxu1 %v506_v19  ;;  %1677 = vmatprep.subr.mxu0 %v508_v24  ;;  %v684_v19 = vunpack.c.h.bf16 %v460_v52  ;;  %v681_v24 = vunpack.c.l.bf16 %v459_v51  ;;  %v674_v32 = vunpack.c.h.bf16 %v455_v16 }
 0x3a4   : > { %1601 = vmatpush1.msra.mxu1 %v505_v25  ;;  %1678 = vmatpush1.msra.mxu0 %v507_v26  ;;  %v683_v25 = vunpack.c.l.bf16 %v460_v52  ;;  %v451_v26 = vld [vmem:[#allocation8 + $0x2b0] sm:$0xff] }
 0x3a5   : > { %1602 = vmatprep.subr.mxu1 %v498_v33  ;;  %1679 = vmatprep.subr.mxu0 %v500_v34  ;;  %v676_v33 = vunpack.c.h.bf16 %v456_v20  ;;  %v673_v34 = vunpack.c.l.bf16 %v455_v16  ;;  %v666_v27 = vunpack.c.h.bf16 %v451_v26 }
 0x3a6   : > { %1603 = vmatpush1.msra.mxu1 %v497_v35  ;;  %1680 = vmatpush1.msra.mxu0 %v499_v36  ;;  %v675_v35 = vunpack.c.l.bf16 %v456_v20  ;;  %v447_v36 = vld [vmem:[#allocation8 + $0x290] sm:$0xff] }
 0x3a7   : > { %1604 = vmatprep.subr.mxu1 %v746_v28  ;;  %1681 = vmatprep.subr.mxu0 %v748_v13  ;;  %v668_v28 = vunpack.c.h.bf16 %v452_v29  ;;  %v665_v13 = vunpack.c.l.bf16 %v451_v26  ;;  %v658_v30 = vunpack.c.h.bf16 %v447_v36 }
 0x3a8   : > { %1605 = vmatpush2.msra.mxu1 %v745_v37  ;;  %1682 = vmatpush2.msra.mxu0 %v747_v38  ;;  %v667_v37 = vunpack.c.l.bf16 %v452_v29  ;;  %v443_v38 = vld [vmem:[#allocation8 + $0x270] sm:$0xff] }
 0x3a9   : > { %1606 = vmatprep.subr.mxu1 %v738_v31  ;;  %1683 = vmatprep.subr.mxu0 %v740_v2  ;;  %v660_v31 = vunpack.c.h.bf16 %v448_v12  ;;  %v657_v2 = vunpack.c.l.bf16 %v447_v36  ;;  %v650_v61 = vunpack.c.h.bf16 %v443_v38 }
 0x3aa   : > { %1607 = vmatpush2.msra.mxu1 %v737_v0  ;;  %1684 = vmatpush2.msra.mxu0 %v739_v3  ;;  %v659_v0 = vunpack.c.l.bf16 %v448_v12  ;;  %v439_v3 = vld [vmem:[#allocation8 + $0x250] sm:$0xff] }
 0x3ab   : > { %1608 = vmatprep.subr.mxu1 %v730_v62  ;;  %1685 = vmatprep.subr.mxu0 %v732_v1  ;;  %v652_v62 = vunpack.c.h.bf16 %v444_v39  ;;  %v649_v1 = vunpack.c.l.bf16 %v443_v38  ;;  %v642_v4 = vunpack.c.h.bf16 %v439_v3 }
 0x3ac   : > { %1609 = vmatpush2.msra.mxu1 %v729_v41  ;;  %1686 = vmatpush2.msra.mxu0 %v731_v42  ;;  %v651_v41 = vunpack.c.l.bf16 %v444_v39  ;;  %v435_v42 = vld [vmem:[#allocation8 + $0x230] sm:$0xff] }
 0x3ad   : > { %1610 = vmatprep.subr.mxu1 %v722_v5  ;;  %1687 = vmatprep.subr.mxu0 %v724_v45  ;;  %v644_v5 = vunpack.c.h.bf16 %v440_v40  ;;  %v641_v45 = vunpack.c.l.bf16 %v439_v3  ;;  %v634_v63 = vunpack.c.h.bf16 %v435_v42 }
 0x3ae   : > { %1611 = vmatpush2.msra.mxu1 %v721_v18  ;;  %1688 = vmatpush2.msra.mxu0 %v723_v17  ;;  %v643_v18 = vunpack.c.l.bf16 %v440_v40  ;;  %v431_v17 = vld [vmem:[#allocation8 + $0x210] sm:$0xff] }
 0x3af   : > { %1612 = vmatprep.subr.mxu1 %v714_v47  ;;  %1689 = vmatprep.subr.mxu0 %v716_v6  ;;  %v636_v47 = vunpack.c.h.bf16 %v436_v44  ;;  %v633_v6 = vunpack.c.l.bf16 %v435_v42  ;;  %v625_v46 = vunpack.c.l.bf16 %v431_v17 }
 0x3b0   : > { %1613 = vmatpush2.msra.mxu1 %v713_v48  ;;  %1690 = vmatpush2.msra.mxu0 %v715_v50  ;;  %v635_v48 = vunpack.c.l.bf16 %v436_v44  ;;  %v626_v50 = vunpack.c.h.bf16 %v431_v17 }
 0x3b1   : > { %1614 = vmatprep.subr.mxu1 %v706_v7  ;;  %1691 = vmatprep.subr.mxu0 %v708_v53  ;;  %v627_v7 = vunpack.c.l.bf16 %v432_v9 }
 0x3b2   : > { %1615 = vmatpush2.msra.mxu1 %v705_v54  ;;  %1692 = vmatpush2.msra.mxu0 %v707_v55 }
 0x3b3   : > { %1616 = vmatprep.subr.mxu1 %v698_v57  ;;  %1693 = vmatprep.subr.mxu0 %v700_v58 }
 0x3b4   : > { %1617 = vmatpush2.msra.mxu1 %v697_v59  ;;  %1694 = vmatpush2.msra.mxu0 %v699_v60 }
 0x3b5   : > { %1618 = vmatprep.subr.mxu1 %v690_v8  ;;  %1695 = vmatprep.subr.mxu0 %v692_v10 }
 0x3b6   : > { %1619 = vmatpush2.msra.mxu1 %v689_v14  ;;  %1696 = vmatpush2.msra.mxu0 %v691_v15 }
 0x3b7   : > { %1620 = vmatprep.subr.mxu1 %v682_v21  ;;  %1697 = vmatprep.subr.mxu0 %v684_v19 }
 0x3b8   : > { %1621 = vmatpush2.msra.mxu1 %v681_v24  ;;  %1698 = vmatpush2.msra.mxu0 %v683_v25 }
 0x3b9   : > { %1622 = vmatprep.subr.mxu1 %v674_v32  ;;  %1699 = vmatprep.subr.mxu0 %v676_v33 }
 0x3ba   : > { %1623 = vmatpush2.msra.mxu1 %v673_v34  ;;  %1700 = vmatpush2.msra.mxu0 %v675_v35 }
 0x3bb   : > { %1624 = vmatprep.subr.mxu1 %v666_v27  ;;  %1701 = vmatprep.subr.mxu0 %v668_v28 }
 0x3bc   : > { %1625 = vmatpush2.msra.mxu1 %v665_v13  ;;  %1702 = vmatpush2.msra.mxu0 %v667_v37 }
 0x3bd   : > { %1626 = vmatprep.subr.mxu1 %v658_v30  ;;  %1703 = vmatprep.subr.mxu0 %v660_v31 }
 0x3be   : > { %1627 = vmatpush2.msra.mxu1 %v657_v2  ;;  %1704 = vmatpush2.msra.mxu0 %v659_v0 }
 0x3bf   : > { %1628 = vmatprep.subr.mxu1 %v650_v61  ;;  %1705 = vmatprep.subr.mxu0 %v652_v62 }
 0x3c0   : > { %1629 = vmatpush2.msra.mxu1 %v649_v1  ;;  %1706 = vmatpush2.msra.mxu0 %v651_v41 }
 0x3c1   : > { %1630 = vmatprep.subr.mxu1 %v642_v4  ;;  %1707 = vmatprep.subr.mxu0 %v644_v5 }
 0x3c2   : > { %1631 = vmatpush2.msra.mxu1 %v641_v45  ;;  %1708 = vmatpush2.msra.mxu0 %v643_v18 }
 0x3c3   : > { %1632 = vmatprep.subr.mxu1 %v634_v63  ;;  %1709 = vmatprep.subr.mxu0 %v636_v47 }
 0x3c4   : > { %1633 = vmatpush2.msra.mxu1 %v633_v6  ;;  %1710 = vmatpush2.msra.mxu0 %v635_v48 }
 0x3c5   : > { %1634 = vmatprep.subr.mxu1 %v626_v50  ;;  %1711 = vmatprep.subr.mxu0 %v628_v43 }
 0x3c6   : > { %1635 = vmatpush2.msra.mxu1 %v625_v46  ;;  %1712 = vmatpush2.msra.mxu0 %v627_v7 }
 0x3c7   : > { %1637 = vmatmul.mubr.f32.vlgmr.msra.gmra.mxu1 %v2891_v49  ;;  %1714 = vmatmul.mubr.f32.vlgmr.msra.gmra.mxu0 %v2891_v49 }
 0x3c8   : > { %1642 = vmatprep.mubr.f32.mxu1 %v2895_v56  ;;  %1719 = vmatprep.mubr.f32.mxu0 %v2895_v56 }
 0x3cb   : > { %1643 = vmatmul.mubr.f32.gmra.mxu1 %v2897_v11  ;;  %1720 = vmatmul.mubr.f32.gmra.mxu0 %v2897_v11 }
 0x444   : > { %v1484_v53 = vpop.f32.mrf.mxu1  ;;  %v1561_v54 = vpop.f32.mrf.mxu0 }
 0x445   : > { %1726 = vst [vmem:[%s2910_s15] sm:$0xff] %v1484_v53  ;;  %1728 = vst [vmem:[%s2910_s15 + $0x10] sm:$0xff] %v1561_v54 }
 0x446   : > { %v1486_v49 = vpop.f32.mrf.mxu1  ;;  %v1563_v56 = vpop.f32.mrf.mxu0 }
 0x447   : > { %1727 = vst [vmem:[%s2910_s15 + $0x8] sm:$0xff] %v1486_v49  ;;  %1729 = vst [vmem:[%s2910_s15 + $0x18] sm:$0xff] %v1563_v56 }
 0x44a   : > { %v1490_v11 = vpop.f32.mrf.mxu1  ;;  %v1567_v55 = vpop.f32.mrf.mxu0 }
 0x44b   : > { %1734 = vst [vmem:[%s2910_s15 + $0x40] sm:$0xff] %v1490_v11  ;;  %1736 = vst [vmem:[%s2910_s15 + $0x50] sm:$0xff] %v1567_v55 }
 0x44c   : > { %v1492_v22 = vpop.f32.mrf.mxu1  ;;  %v1569_v23 = vpop.f32.mrf.mxu0 }
 0x44d   : > { %1735 = vst [vmem:[%s2910_s15 + $0x48] sm:$0xff] %v1492_v22  ;;  %1737 = vst [vmem:[%s2910_s15 + $0x58] sm:$0xff] %v1569_v23 }
 0x487   : > { %v1638_v57 = vpop.f32.mrf.mxu1  ;;  %v1715_v58 = vpop.f32.mrf.mxu0 }
 0x488   : > { %1730 = vst [vmem:[%s2910_s15 + $0x20] sm:$0xff] %v1638_v57  ;;  %1732 = vst [vmem:[%s2910_s15 + $0x30] sm:$0xff] %v1715_v58 }
 0x489   : > { %v1640_v59 = vpop.f32.mrf.mxu1  ;;  %v1717_v60 = vpop.f32.mrf.mxu0 }
 0x48a   : > { %1731 = vst [vmem:[%s2910_s15 + $0x28] sm:$0xff] %v1640_v59  ;;  %1733 = vst [vmem:[%s2910_s15 + $0x38] sm:$0xff] %v1717_v60 }
 0x48b   : > { %v1644_v51 = vpop.f32.mrf.mxu1  ;;  %v1721_v52 = vpop.f32.mrf.mxu0 }
 0x48c   : > { %1738 = vst [vmem:[%s2910_s15 + $0x60] sm:$0xff] %v1644_v51  ;;  %1740 = vst [vmem:[%s2910_s15 + $0x70] sm:$0xff] %v1721_v52 }
 0x48d   : > { %v1646_v8 = vpop.f32.mrf.mxu1  ;;  %v1723_v10 = vpop.f32.mrf.mxu0 }
 0x48e   : > { %1739 = vst [vmem:[%s2910_s15 + $0x68] sm:$0xff] %v1646_v8  ;;  %1741 = vst [vmem:[%s2910_s15 + $0x78] sm:$0xff] %v1723_v10 }
 0x48f   : > { %2100 = shalt.err (!%p2097_p9)
}
 0x490   : > { %s2101_s17 = scalar_lea.hbm %s2929_s29, 2048  ;;  %s2105_s11 = scalar_lea.hbm %s2985_s7, 4096 }
 0x491   : > { %p2102_p7 = scmp.ne.s32.totalorder %s2929_s29, %s2101_s17  ;;  %p2106_p1 = scmp.lt.s32.totalorder %s2929_s29, %s2985_s7 }
 0x492   : > { %p2107_p11 = scmp.lt.s32.totalorder %s2105_s11, %s2101_s17 }
 0x493   : > { %p2103_p4 = pnand %p2102_p7, %p3005_p0 }
 0x494   : > { %p2108_p13 = por %p2107_p11, %p2106_p1 }
 0x495   : > { %p2104_p8 = pneg %p2103_p4 }
 0x497   : > { %p2109_p12 = pnand %p2108_p13, %p2104_p8 }
 0x499   : > { %2112 = shalt.err (!%p2109_p12)
}
 0x49a   : > { %s2183_s21 = smov 1024   ;;  %s2184_s3 = smov 64  }
 0x49b   : > { %1897 = dma.vmem_to_hbm [thread:$0]  (%p3005_p0), %s2931_s18, 2048, %s2929_s29, %s1743_s28, %s2183_s21, %s2183_s21, %s2184_s3  }
 0x49c PF: > { %s1771_s10 = sand.u32 1, %s2147_s24   ;;  %p3006_p5 = scmp.ne.s32.totalorder %s2992_s8, 0 }
 0x49d   : > { %p3007_p10 = scmp.ge.s32.totalorder %s2159_s27, 2  ;;  %s1772_s13 = scalar_lea.sflag [#allocation4], %s1771_s10 }
 0x49f   : > { %p1914_p3 = pnand %p3007_p10, %p3006_p5 }
 0x4a1   : > { %p1915_p2 = pneg %p1914_p3 }
 0x4a3   : > { %2142 = dma.done.wait (%p1915_p2), %s1772_s13, 2048  }
 0x4a4   : > { %2144 = vsyncadd (%p1915_p2), %s1772_s13, 4294965248  ;;  %p22_p6 = scmp.ge.s32.totalorder %s2305_s14, 4   ;;  %s3008_s24 = smov %s2151_s25 }
 0x4a5   : > { %s3009_s25 = smov %s2155_s26  ;;  %s3010_s26 = smov %s2321_s20 }
 0x4a6   : > { %s3011_s27 = smov %s2305_s14  ;;  %24 = sbr.rel (!%p22_p6) target bundleno = 9 (0x9), region = 105 }
 0x4ab   :  { %1777 = vsyncpa [#allocation3], 1 }
 0x4ac   :  { %1779 = vsyncpa [#allocation3 + $0x1], 1 }
 0x4ad   :  { %1780 = vsyncpa [#allocation6], 1 }
 0x4ae   :  { %1781 = vsyncpa [#allocation9], 1 }
 0x4af   :  { %1782 = vsyncpa [#allocation4], 1 }
 0x4b0   :  { %1784 = vsyncpa [#allocation4 + $0x1], 1 }

</bundles_post_ra>
